<compile_context>
chip_gen: v6e
topology: v6e:2x2x1
jax: 0.10.0
libtpu: 0.0.40
codegen_flags: <defaults>
</compile_context>

<pallas_src>
import jax
import jax.numpy as jnp
from jax.experimental import pallas as pl
from jax.experimental.pallas import tpu as pltpu

# ----- small synthetic BERT config -----
VOCAB = 100
HIDDEN = 32
N_LAYERS = 2
N_HEADS = 4
HEAD_DIM = HIDDEN // N_HEADS
INTERMEDIATE = 64
MAX_POS = 16
NUM_LABELS = 2
LN_EPS = 1e-12
LOGIT_PAD = 128          # lane-dense classifier output; sliced to NUM_LABELS outside

# packed per-layer weight-matrix column offsets: [Wq|Wk|Wv | Wo | W1 | W2^T]
_QKV0, _QKV1 = 0, 3 * HIDDEN
_WO0, _WO1 = _QKV1, _QKV1 + HIDDEN
_W10, _W11 = _WO1, _WO1 + INTERMEDIATE
_W20, _W21 = _W11, _W11 + INTERMEDIATE
W_COLS = _W21            # 256
V_COLS = 3 * HIDDEN      # 96  (widest per-layer vector: the fused QKV bias)


# ---------------- fused Pallas kernel (one sequence per grid step) ----------------

def bert_fused_kernel(x_ref, mask_ref, w_ref, v_ref, hw_ref, hv_ref, out_ref):
    # x_ref   : [S, HIDDEN]                       embeddings (pre-LN) of this sequence
    # mask_ref: [1, S]                            HF-style additive attention mask
    # w_ref   : [N_LAYERS, HIDDEN, W_COLS]        packed per-layer matmul weights
    # v_ref   : [N_LAYERS, 8, V_COLS]             packed per-layer biases / LN params
    # hw_ref  : [HIDDEN, HIDDEN + LOGIT_PAD]      pooler W | padded classifier W
    # hv_ref  : [4, LOGIT_PAD]                    emb-LN g, emb-LN b, pooler b, classifier b
    # out_ref : [1, LOGIT_PAD]                    padded logits for this sequence

    def layer_norm(x, g, b):
        mu = jnp.mean(x, axis=-1, keepdims=True)
        xc = x - mu
        var = jnp.mean(xc * xc, axis=-1, keepdims=True)
        return xc * jax.lax.rsqrt(var + LN_EPS) * g + b

    hv = hv_ref[...]
    emb_g = hv[0:1, :HIDDEN]
    emb_b = hv[1:2, :HIDDEN]
    pool_b = hv[2:3, :HIDDEN]
    cls_b = hv[3:4, :]

    # embedding layernorm; residual stream stays in VMEM/vregs from here on
    x = layer_norm(x_ref[...], emb_g, emb_b)          # [S, HIDDEN]
    mask = mask_ref[...]                               # [1, S] broadcasts over query rows

    for l in range(N_LAYERS):                          # N_LAYERS=2: trace-time unroll is fine
        wl = w_ref[l]                                  # [HIDDEN, W_COLS]
        vl = v_ref[l]                                  # [8, V_COLS]
        wqkv = wl[:, _QKV0:_QKV1]
        wo = wl[:, _WO0:_WO1]
        w1 = wl[:, _W10:_W11]
        w2t = wl[:, _W20:_W21]                         # W2 stored transposed: [HIDDEN, INTERMEDIATE]
        bqkv = vl[0:1, :]
        bo = vl[1:2, :HIDDEN]
        b1 = vl[2:3, :INTERMEDIATE]
        b2 = vl[3:4, :HIDDEN]
        ln1g, ln1b = vl[4:5, :HIDDEN], vl[5:6, :HIDDEN]
        ln2g, ln2b = vl[6:7, :HIDDEN], vl[7:8, :HIDDEN]

        # ---- fused QKV projection (q columns pre-scaled by 1/sqrt(HEAD_DIM) at init) ----
        qkv = jnp.dot(x, wqkv, preferred_element_type=jnp.float32) + bqkv   # [S, 3H]

        # ---- multi-head attention: per-head [S,S] score / softmax / context ----
        heads = []
        for h in range(N_HEADS):
            qh = qkv[:, h * HEAD_DIM:(h + 1) * HEAD_DIM]
            kh = qkv[:, HIDDEN + h * HEAD_DIM: HIDDEN + (h + 1) * HEAD_DIM]
            vh = qkv[:, 2 * HIDDEN + h * HEAD_DIM: 2 * HIDDEN + (h + 1) * HEAD_DIM]
            s = jax.lax.dot_general(qh, kh, (((1,), (1,)), ((), ())),
                                    preferred_element_type=jnp.float32) + mask
            s = s - jnp.max(s, axis=-1, keepdims=True)
            p = jnp.exp(s)
            # TODO(synk): approx reciprocal (EUP) -> tiny relative error vs. exact HF softmax.
            p = p * pl.reciprocal(jnp.sum(p, axis=-1, keepdims=True), approx=True)
            heads.append(jnp.dot(p, vh, preferred_element_type=jnp.float32))
        ctx = jnp.concatenate(heads, axis=-1)          # [S, HIDDEN]

        # ---- output projection + fused residual + layernorm ----
        attn_out = jnp.dot(ctx, wo, preferred_element_type=jnp.float32) + bo
        x = layer_norm(x + attn_out, ln1g, ln1b)

        # ---- FFN + fused residual + layernorm ----
        h1 = jnp.dot(x, w1, preferred_element_type=jnp.float32) + b1
        # TODO(synk): HF BERT default is exact erf-GELU; tanh approximation used here.
        h1 = jax.nn.gelu(h1, approximate=True)
        ff = jax.lax.dot_general(h1, w2t, (((1,), (1,)), ((), ())),
                                 preferred_element_type=jnp.float32) + b2
        x = layer_norm(x + ff, ln2g, ln2b)

    # ---- pooler (tanh on [CLS] token row 0) + classifier, lane-dense padded output ----
    hw = hw_ref[...]
    pooled = jnp.tanh(
        jnp.dot(x[0:1, :], hw[:, :HIDDEN], preferred_element_type=jnp.float32) + pool_b)
    out_ref[...] = (
        jnp.dot(pooled, hw[:, HIDDEN:], preferred_element_type=jnp.float32) + cls_b)


def _full_spec(shape):
    # whole-array block, fetched once (constant index_map across the batch grid)
    return pl.BlockSpec(shape, lambda b: (0,) * len(shape))


# ---------------- parameters & forward ----------------

def init_params(key):
    std = 0.02
    keys = iter(jax.random.split(key, 512))
    nrm = lambda shape: std * jax.random.normal(next(keys), shape, jnp.float32)
    attn_scale = 1.0 / float(HEAD_DIM) ** 0.5

    w_layers, v_layers = [], []
    for _ in range(N_LAYERS):
        wq = nrm((HIDDEN, HIDDEN)) * attn_scale        # fold 1/sqrt(HEAD_DIM) into Wq
        wk = nrm((HIDDEN, HIDDEN))
        wv = nrm((HIDDEN, HIDDEN))
        wo = nrm((HIDDEN, HIDDEN))
        w1 = nrm((HIDDEN, INTERMEDIATE))
        w2 = nrm((INTERMEDIATE, HIDDEN))
        w_layers.append(jnp.concatenate([wq, wk, wv, wo, w1, w2.T], axis=1))  # [H, W_COLS]

        # packed per-layer vectors: rows = [bqkv | bo | b1 | b2 | ln1_g | ln1_b | ln2_g | ln2_b]
        # (biases are zero; a non-zero q-bias would also be scaled by attn_scale)
        vrows = jnp.zeros((8, V_COLS), jnp.float32)
        vrows = vrows.at[4, :HIDDEN].set(1.0)          # ln1 gamma
        vrows = vrows.at[6, :HIDDEN].set(1.0)          # ln2 gamma
        v_layers.append(vrows)

    pool_w = nrm((HIDDEN, HIDDEN))
    cls_w = nrm((HIDDEN, NUM_LABELS))
    cls_w_pad = jnp.zeros((HIDDEN, LOGIT_PAD), jnp.float32).at[:, :NUM_LABELS].set(cls_w)
    head_w = jnp.concatenate([pool_w, cls_w_pad], axis=1)       # [H, H + LOGIT_PAD]

    # packed head vectors: rows = [emb_ln_g | emb_ln_b | pool_b | cls_b_pad]
    head_v = jnp.zeros((4, LOGIT_PAD), jnp.float32).at[0, :HIDDEN].set(1.0)

    return {
        "word_emb": nrm((VOCAB, HIDDEN)),
        "pos_emb": nrm((MAX_POS, HIDDEN)),
        "type_emb": nrm((2, HIDDEN)),
        "w_layers": jnp.stack(w_layers),               # [N_LAYERS, HIDDEN, W_COLS]
        "v_layers": jnp.stack(v_layers),               # [N_LAYERS, 8, V_COLS]
        "head_w": head_w,
        "head_v": head_v,
    }


def bert_forward(params, input_ids, attention_mask):
    B, S = input_ids.shape

    # --- embeddings (data-dependent gather stays as plain-JAX glue) ---
    # TODO(synk): token_type_ids assumed all-zero (type embedding row 0), as in this harness.
    x = (jnp.take(params["word_emb"], input_ids, axis=0)
         + params["pos_emb"][None, :S, :]
         + params["type_emb"][0][None, None, :])                       # [B, S, HIDDEN]

    # HF-style extended additive mask: (1 - mask) * -10000, shape [B, 1, S]
    mask_add = ((1.0 - attention_mask.astype(jnp.float32)) * -10000.0)[:, None, :]

    inputs = (x, mask_add, params["w_layers"], params["v_layers"],
              params["head_w"], params["head_v"])

    logits_pad = pl.pallas_call(
        bert_fused_kernel,
        out_shape=jax.ShapeDtypeStruct((B, 1, LOGIT_PAD), jnp.float32),
        grid=(B,),
        in_specs=[
            pl.BlockSpec((None, S, HIDDEN), lambda b: (b, 0, 0)),      # per-sequence activations
            pl.BlockSpec((None, 1, S), lambda b: (b, 0, 0)),           # per-sequence mask
            _full_spec(params["w_layers"].shape),
            _full_spec(params["v_layers"].shape),
            _full_spec(params["head_w"].shape),
            _full_spec(params["head_v"].shape),
        ],
        out_specs=pl.BlockSpec((None, 1, LOGIT_PAD), lambda b: (b, 0, 0)),
        compiler_params=pltpu.CompilerParams(
            dimension_semantics=("parallel",)),                        # v7x: batches across cores
    )(*inputs)

    # dropout before classifier is identity in eval mode
    return logits_pad[:, 0, :NUM_LABELS]    # [B, NUM_LABELS] == bert_output[0]


if __name__ == "__main__":
    key = jax.random.PRNGKey(0)
    pkey, ikey = jax.random.split(key)
    params = init_params(pkey)

    B, S = 2, 8
    input_ids = jax.random.randint(ikey, (B, S), 0, VOCAB, dtype=jnp.int32)
    attention_mask = jnp.ones((B, S), dtype=jnp.int32)
    attention_mask = attention_mask.at[1, 5:].set(0)   # pad tail of 2nd sequence

    logits = jax.jit(bert_forward)(params, input_ids, attention_mask)
    jax.block_until_ready(logits)
    assert logits.shape == (B, NUM_LABELS) and logits.dtype == jnp.float32
    print("KERNEL_OK")
</pallas_src>

<mosaic_0001>
module attributes {stable_mosaic.version = 11 : i64} {
  func.func @bert_fused_kernel(%arg0: i32, %arg1: memref<1x8x32xf32, #tpu.memory_space<vmem>>, %arg2: memref<1x1x8xf32, #tpu.memory_space<vmem>>, %arg3: memref<2x32x256xf32, #tpu.memory_space<vmem>>, %arg4: memref<2x8x96xf32, #tpu.memory_space<vmem>>, %arg5: memref<32x160xf32, #tpu.memory_space<vmem>>, %arg6: memref<4x128xf32, #tpu.memory_space<vmem>>, %arg7: memref<1x1x128xf32, #tpu.memory_space<vmem>>) attributes {dimension_semantics = [#tpu.dimension_semantics<parallel>], iteration_bounds = array<i64: 2>, scalar_prefetch = 0 : i64, scratch_operands = 0 : i64, tpu.core_type = #tpu.core_type<tc>, window_params = [{transform_indices = @transform_0, window_bounds = array<i64: 1, 8, 32>}, {transform_indices = @transform_1, window_bounds = array<i64: 1, 1, 8>}, {pipeline_mode = #tpu.pipeline_mode<synchronous>, transform_indices = @transform_2, window_bounds = array<i64: 2, 32, 256>}, {pipeline_mode = #tpu.pipeline_mode<synchronous>, transform_indices = @transform_3, window_bounds = array<i64: 2, 8, 96>}, {pipeline_mode = #tpu.pipeline_mode<synchronous>, transform_indices = @transform_4, window_bounds = array<i64: 32, 160>}, {pipeline_mode = #tpu.pipeline_mode<synchronous>, transform_indices = @transform_5, window_bounds = array<i64: 4, 128>}, {transform_indices = @transform_6, window_bounds = array<i64: 1, 1, 128>}]} {
    %c0 = arith.constant 0 : index
    %c0_0 = arith.constant 0 : index
    %0 = vector.load %arg6[%c0, %c0_0] : memref<4x128xf32, #tpu.memory_space<vmem>>, vector<4x128xf32>
    %1 = vector.extract_strided_slice %0 {offsets = [0, 0], sizes = [1, 32], strides = [1, 1]} : vector<4x128xf32> to vector<1x32xf32>
    %2 = vector.extract_strided_slice %0 {offsets = [1, 0], sizes = [1, 32], strides = [1, 1]} : vector<4x128xf32> to vector<1x32xf32>
    %3 = vector.extract_strided_slice %0 {offsets = [2, 0], sizes = [1, 32], strides = [1, 1]} : vector<4x128xf32> to vector<1x32xf32>
    %4 = vector.extract_strided_slice %0 {offsets = [3, 0], sizes = [1, 128], strides = [1, 1]} : vector<4x128xf32> to vector<1x128xf32>
    %c0_1 = arith.constant 0 : index
    %c0_2 = arith.constant 0 : index
    %c0_3 = arith.constant 0 : index
    %5 = vector.load %arg1[%c0_1, %c0_2, %c0_3] : memref<1x8x32xf32, #tpu.memory_space<vmem>>, vector<1x8x32xf32>
    %6 = vector.shape_cast %5 : vector<1x8x32xf32> to vector<8x32xf32>
    %cst = arith.constant dense<0.000000e+00> : vector<8xf32>
    %7 = vector.multi_reduction <add>, %6, %cst [1] : vector<8x32xf32> to vector<8xf32>
    %8 = vector.shape_cast %7 : vector<8xf32> to vector<8x1xf32>
    %cst_4 = arith.constant 3.200000e+01 : f32
    %9 = vector.broadcast %cst_4 : f32 to vector<8x1xf32>
    %10 = arith.divf %8, %9 : vector<8x1xf32>
    %11 = vector.broadcast %10 : vector<8x1xf32> to vector<8x32xf32>
    %12 = arith.subf %6, %11 : vector<8x32xf32>
    %13 = arith.mulf %12, %12 : vector<8x32xf32>
    %cst_5 = arith.constant dense<0.000000e+00> : vector<8xf32>
    %14 = vector.multi_reduction <add>, %13, %cst_5 [1] : vector<8x32xf32> to vector<8xf32>
    %15 = vector.shape_cast %14 : vector<8xf32> to vector<8x1xf32>
    %cst_6 = arith.constant 3.200000e+01 : f32
    %16 = vector.broadcast %cst_6 : f32 to vector<8x1xf32>
    %17 = arith.divf %15, %16 : vector<8x1xf32>
    %cst_7 = arith.constant 9.99999996E-13 : f32
    %18 = vector.broadcast %cst_7 : f32 to vector<8x1xf32>
    %19 = arith.addf %17, %18 : vector<8x1xf32>
    %20 = math.rsqrt %19 : vector<8x1xf32>
    %21 = vector.broadcast %20 : vector<8x1xf32> to vector<8x32xf32>
    %22 = arith.mulf %12, %21 : vector<8x32xf32>
    %23 = vector.broadcast %1 : vector<1x32xf32> to vector<8x32xf32>
    %24 = arith.mulf %22, %23 : vector<8x32xf32>
    %25 = vector.broadcast %2 : vector<1x32xf32> to vector<8x32xf32>
    %26 = arith.addf %24, %25 : vector<8x32xf32>
    %c0_8 = arith.constant 0 : index
    %c0_9 = arith.constant 0 : index
    %c0_10 = arith.constant 0 : index
    %27 = vector.load %arg2[%c0_8, %c0_9, %c0_10] : memref<1x1x8xf32, #tpu.memory_space<vmem>>, vector<1x1x8xf32>
    %28 = vector.shape_cast %27 : vector<1x1x8xf32> to vector<1x8xf32>
    %c0_11 = arith.constant 0 : index
    %c0_12 = arith.constant 0 : index
    %c0_13 = arith.constant 0 : index
    %29 = vector.load %arg3[%c0_11, %c0_12, %c0_13] : memref<2x32x256xf32, #tpu.memory_space<vmem>>, vector<1x32x256xf32>
    %30 = vector.shape_cast %29 : vector<1x32x256xf32> to vector<32x256xf32>
    %c0_14 = arith.constant 0 : index
    %c0_15 = arith.constant 0 : index
    %c0_16 = arith.constant 0 : index
    %31 = vector.load %arg4[%c0_14, %c0_15, %c0_16] : memref<2x8x96xf32, #tpu.memory_space<vmem>>, vector<1x8x96xf32>
    %32 = vector.shape_cast %31 : vector<1x8x96xf32> to vector<8x96xf32>
    %33 = vector.extract_strided_slice %30 {offsets = [0, 0], sizes = [32, 96], strides = [1, 1]} : vector<32x256xf32> to vector<32x96xf32>
    %34 = vector.extract_strided_slice %30 {offsets = [0, 96], sizes = [32, 32], strides = [1, 1]} : vector<32x256xf32> to vector<32x32xf32>
    %35 = vector.extract_strided_slice %30 {offsets = [0, 128], sizes = [32, 64], strides = [1, 1]} : vector<32x256xf32> to vector<32x64xf32>
    %36 = vector.extract_strided_slice %30 {offsets = [0, 192], sizes = [32, 64], strides = [1, 1]} : vector<32x256xf32> to vector<32x64xf32>
    %37 = vector.extract_strided_slice %32 {offsets = [0, 0], sizes = [1, 96], strides = [1, 1]} : vector<8x96xf32> to vector<1x96xf32>
    %38 = vector.extract_strided_slice %32 {offsets = [1, 0], sizes = [1, 32], strides = [1, 1]} : vector<8x96xf32> to vector<1x32xf32>
    %39 = vector.extract_strided_slice %32 {offsets = [2, 0], sizes = [1, 64], strides = [1, 1]} : vector<8x96xf32> to vector<1x64xf32>
    %40 = vector.extract_strided_slice %32 {offsets = [3, 0], sizes = [1, 32], strides = [1, 1]} : vector<8x96xf32> to vector<1x32xf32>
    %41 = vector.extract_strided_slice %32 {offsets = [4, 0], sizes = [1, 32], strides = [1, 1]} : vector<8x96xf32> to vector<1x32xf32>
    %42 = vector.extract_strided_slice %32 {offsets = [5, 0], sizes = [1, 32], strides = [1, 1]} : vector<8x96xf32> to vector<1x32xf32>
    %43 = vector.extract_strided_slice %32 {offsets = [6, 0], sizes = [1, 32], strides = [1, 1]} : vector<8x96xf32> to vector<1x32xf32>
    %44 = vector.extract_strided_slice %32 {offsets = [7, 0], sizes = [1, 32], strides = [1, 1]} : vector<8x96xf32> to vector<1x32xf32>
    %cst_17 = arith.constant dense<0.000000e+00> : vector<8x96xf32>
    %45 = tpu.matmul %26, %33, %cst_17 {dimension_numbers = #tpu.dot_dimension_numbers<[1], [0], [0], [1], [0, 0, 1, 1], [], []>} : vector<8x32xf32>, vector<32x96xf32>, vector<8x96xf32> -> vector<8x96xf32>
    %46 = vector.broadcast %37 : vector<1x96xf32> to vector<8x96xf32>
    %47 = arith.addf %45, %46 : vector<8x96xf32>
    %48 = vector.extract_strided_slice %47 {offsets = [0, 0], sizes = [8, 8], strides = [1, 1]} : vector<8x96xf32> to vector<8x8xf32>
    %49 = vector.extract_strided_slice %47 {offsets = [0, 32], sizes = [8, 8], strides = [1, 1]} : vector<8x96xf32> to vector<8x8xf32>
    %50 = vector.extract_strided_slice %47 {offsets = [0, 64], sizes = [8, 8], strides = [1, 1]} : vector<8x96xf32> to vector<8x8xf32>
    %cst_18 = arith.constant dense<0.000000e+00> : vector<8x8xf32>
    %51 = tpu.matmul %48, %49, %cst_18 {dimension_numbers = #tpu.dot_dimension_numbers<[1], [1], [0], [0], [0, 0, 1, 0], [], []>} : vector<8x8xf32>, vector<8x8xf32>, vector<8x8xf32> -> vector<8x8xf32>
    %52 = vector.broadcast %28 : vector<1x8xf32> to vector<8x8xf32>
    %53 = arith.addf %51, %52 : vector<8x8xf32>
    %cst_19 = arith.constant dense<0xFF800000> : vector<8xf32>
    %54 = vector.multi_reduction <maximumf>, %53, %cst_19 [1] : vector<8x8xf32> to vector<8xf32>
    %55 = vector.shape_cast %54 : vector<8xf32> to vector<8x1xf32>
    %56 = vector.broadcast %55 : vector<8x1xf32> to vector<8x8xf32>
    %57 = arith.subf %53, %56 : vector<8x8xf32>
    %58 = math.exp %57 : vector<8x8xf32>
    %cst_20 = arith.constant dense<0.000000e+00> : vector<8xf32>
    %59 = vector.multi_reduction <add>, %58, %cst_20 [1] : vector<8x8xf32> to vector<8xf32>
    %60 = vector.shape_cast %59 : vector<8xf32> to vector<8x1xf32>
    %61 = tpu.reciprocal %60 {approx = true} : vector<8x1xf32> -> vector<8x1xf32>
    %62 = vector.broadcast %61 : vector<8x1xf32> to vector<8x8xf32>
    %63 = arith.mulf %58, %62 : vector<8x8xf32>
    %cst_21 = arith.constant dense<0.000000e+00> : vector<8x8xf32>
    %64 = tpu.matmul %63, %50, %cst_21 {dimension_numbers = #tpu.dot_dimension_numbers<[1], [0], [0], [1], [0, 0, 1, 1], [], []>} : vector<8x8xf32>, vector<8x8xf32>, vector<8x8xf32> -> vector<8x8xf32>
    %65 = vector.extract_strided_slice %47 {offsets = [0, 8], sizes = [8, 8], strides = [1, 1]} : vector<8x96xf32> to vector<8x8xf32>
    %66 = vector.extract_strided_slice %47 {offsets = [0, 40], sizes = [8, 8], strides = [1, 1]} : vector<8x96xf32> to vector<8x8xf32>
    %67 = vector.extract_strided_slice %47 {offsets = [0, 72], sizes = [8, 8], strides = [1, 1]} : vector<8x96xf32> to vector<8x8xf32>
    %cst_22 = arith.constant dense<0.000000e+00> : vector<8x8xf32>
    %68 = tpu.matmul %65, %66, %cst_22 {dimension_numbers = #tpu.dot_dimension_numbers<[1], [1], [0], [0], [0, 0, 1, 0], [], []>} : vector<8x8xf32>, vector<8x8xf32>, vector<8x8xf32> -> vector<8x8xf32>
    %69 = vector.broadcast %28 : vector<1x8xf32> to vector<8x8xf32>
    %70 = arith.addf %68, %69 : vector<8x8xf32>
    %cst_23 = arith.constant dense<0xFF800000> : vector<8xf32>
    %71 = vector.multi_reduction <maximumf>, %70, %cst_23 [1] : vector<8x8xf32> to vector<8xf32>
    %72 = vector.shape_cast %71 : vector<8xf32> to vector<8x1xf32>
    %73 = vector.broadcast %72 : vector<8x1xf32> to vector<8x8xf32>
    %74 = arith.subf %70, %73 : vector<8x8xf32>
    %75 = math.exp %74 : vector<8x8xf32>
    %cst_24 = arith.constant dense<0.000000e+00> : vector<8xf32>
    %76 = vector.multi_reduction <add>, %75, %cst_24 [1] : vector<8x8xf32> to vector<8xf32>
    %77 = vector.shape_cast %76 : vector<8xf32> to vector<8x1xf32>
    %78 = tpu.reciprocal %77 {approx = true} : vector<8x1xf32> -> vector<8x1xf32>
    %79 = vector.broadcast %78 : vector<8x1xf32> to vector<8x8xf32>
    %80 = arith.mulf %75, %79 : vector<8x8xf32>
    %cst_25 = arith.constant dense<0.000000e+00> : vector<8x8xf32>
    %81 = tpu.matmul %80, %67, %cst_25 {dimension_numbers = #tpu.dot_dimension_numbers<[1], [0], [0], [1], [0, 0, 1, 1], [], []>} : vector<8x8xf32>, vector<8x8xf32>, vector<8x8xf32> -> vector<8x8xf32>
    %82 = vector.extract_strided_slice %47 {offsets = [0, 16], sizes = [8, 8], strides = [1, 1]} : vector<8x96xf32> to vector<8x8xf32>
    %83 = vector.extract_strided_slice %47 {offsets = [0, 48], sizes = [8, 8], strides = [1, 1]} : vector<8x96xf32> to vector<8x8xf32>
    %84 = vector.extract_strided_slice %47 {offsets = [0, 80], sizes = [8, 8], strides = [1, 1]} : vector<8x96xf32> to vector<8x8xf32>
    %cst_26 = arith.constant dense<0.000000e+00> : vector<8x8xf32>
    %85 = tpu.matmul %82, %83, %cst_26 {dimension_numbers = #tpu.dot_dimension_numbers<[1], [1], [0], [0], [0, 0, 1, 0], [], []>} : vector<8x8xf32>, vector<8x8xf32>, vector<8x8xf32> -> vector<8x8xf32>
    %86 = vector.broadcast %28 : vector<1x8xf32> to vector<8x8xf32>
    %87 = arith.addf %85, %86 : vector<8x8xf32>
    %cst_27 = arith.constant dense<0xFF800000> : vector<8xf32>
    %88 = vector.multi_reduction <maximumf>, %87, %cst_27 [1] : vector<8x8xf32> to vector<8xf32>
    %89 = vector.shape_cast %88 : vector<8xf32> to vector<8x1xf32>
    %90 = vector.broadcast %89 : vector<8x1xf32> to vector<8x8xf32>
    %91 = arith.subf %87, %90 : vector<8x8xf32>
    %92 = math.exp %91 : vector<8x8xf32>
    %cst_28 = arith.constant dense<0.000000e+00> : vector<8xf32>
    %93 = vector.multi_reduction <add>, %92, %cst_28 [1] : vector<8x8xf32> to vector<8xf32>
    %94 = vector.shape_cast %93 : vector<8xf32> to vector<8x1xf32>
    %95 = tpu.reciprocal %94 {approx = true} : vector<8x1xf32> -> vector<8x1xf32>
    %96 = vector.broadcast %95 : vector<8x1xf32> to vector<8x8xf32>
    %97 = arith.mulf %92, %96 : vector<8x8xf32>
    %cst_29 = arith.constant dense<0.000000e+00> : vector<8x8xf32>
    %98 = tpu.matmul %97, %84, %cst_29 {dimension_numbers = #tpu.dot_dimension_numbers<[1], [0], [0], [1], [0, 0, 1, 1], [], []>} : vector<8x8xf32>, vector<8x8xf32>, vector<8x8xf32> -> vector<8x8xf32>
    %99 = vector.extract_strided_slice %47 {offsets = [0, 24], sizes = [8, 8], strides = [1, 1]} : vector<8x96xf32> to vector<8x8xf32>
    %100 = vector.extract_strided_slice %47 {offsets = [0, 56], sizes = [8, 8], strides = [1, 1]} : vector<8x96xf32> to vector<8x8xf32>
    %101 = vector.extract_strided_slice %47 {offsets = [0, 88], sizes = [8, 8], strides = [1, 1]} : vector<8x96xf32> to vector<8x8xf32>
    %cst_30 = arith.constant dense<0.000000e+00> : vector<8x8xf32>
    %102 = tpu.matmul %99, %100, %cst_30 {dimension_numbers = #tpu.dot_dimension_numbers<[1], [1], [0], [0], [0, 0, 1, 0], [], []>} : vector<8x8xf32>, vector<8x8xf32>, vector<8x8xf32> -> vector<8x8xf32>
    %103 = vector.broadcast %28 : vector<1x8xf32> to vector<8x8xf32>
    %104 = arith.addf %102, %103 : vector<8x8xf32>
    %cst_31 = arith.constant dense<0xFF800000> : vector<8xf32>
    %105 = vector.multi_reduction <maximumf>, %104, %cst_31 [1] : vector<8x8xf32> to vector<8xf32>
    %106 = vector.shape_cast %105 : vector<8xf32> to vector<8x1xf32>
    %107 = vector.broadcast %106 : vector<8x1xf32> to vector<8x8xf32>
    %108 = arith.subf %104, %107 : vector<8x8xf32>
    %109 = math.exp %108 : vector<8x8xf32>
    %cst_32 = arith.constant dense<0.000000e+00> : vector<8xf32>
    %110 = vector.multi_reduction <add>, %109, %cst_32 [1] : vector<8x8xf32> to vector<8xf32>
    %111 = vector.shape_cast %110 : vector<8xf32> to vector<8x1xf32>
    %112 = tpu.reciprocal %111 {approx = true} : vector<8x1xf32> -> vector<8x1xf32>
    %113 = vector.broadcast %112 : vector<8x1xf32> to vector<8x8xf32>
    %114 = arith.mulf %109, %113 : vector<8x8xf32>
    %cst_33 = arith.constant dense<0.000000e+00> : vector<8x8xf32>
    %115 = tpu.matmul %114, %101, %cst_33 {dimension_numbers = #tpu.dot_dimension_numbers<[1], [0], [0], [1], [0, 0, 1, 1], [], []>} : vector<8x8xf32>, vector<8x8xf32>, vector<8x8xf32> -> vector<8x8xf32>
    %116 = tpu.concatenate %64, %81, %98, %115 in 1 : vector<8x8xf32>, vector<8x8xf32>, vector<8x8xf32>, vector<8x8xf32> -> vector<8x32xf32>
    %cst_34 = arith.constant dense<0.000000e+00> : vector<8x32xf32>
    %117 = tpu.matmul %116, %34, %cst_34 {dimension_numbers = #tpu.dot_dimension_numbers<[1], [0], [0], [1], [0, 0, 1, 1], [], []>} : vector<8x32xf32>, vector<32x32xf32>, vector<8x32xf32> -> vector<8x32xf32>
    %118 = vector.broadcast %38 : vector<1x32xf32> to vector<8x32xf32>
    %119 = arith.addf %117, %118 : vector<8x32xf32>
    %120 = arith.addf %26, %119 : vector<8x32xf32>
    %cst_35 = arith.constant dense<0.000000e+00> : vector<8xf32>
    %121 = vector.multi_reduction <add>, %120, %cst_35 [1] : vector<8x32xf32> to vector<8xf32>
    %122 = vector.shape_cast %121 : vector<8xf32> to vector<8x1xf32>
    %cst_36 = arith.constant 3.200000e+01 : f32
    %123 = vector.broadcast %cst_36 : f32 to vector<8x1xf32>
    %124 = arith.divf %122, %123 : vector<8x1xf32>
    %125 = vector.broadcast %124 : vector<8x1xf32> to vector<8x32xf32>
    %126 = arith.subf %120, %125 : vector<8x32xf32>
    %127 = arith.mulf %126, %126 : vector<8x32xf32>
    %cst_37 = arith.constant dense<0.000000e+00> : vector<8xf32>
    %128 = vector.multi_reduction <add>, %127, %cst_37 [1] : vector<8x32xf32> to vector<8xf32>
    %129 = vector.shape_cast %128 : vector<8xf32> to vector<8x1xf32>
    %cst_38 = arith.constant 3.200000e+01 : f32
    %130 = vector.broadcast %cst_38 : f32 to vector<8x1xf32>
    %131 = arith.divf %129, %130 : vector<8x1xf32>
    %cst_39 = arith.constant 9.99999996E-13 : f32
    %132 = vector.broadcast %cst_39 : f32 to vector<8x1xf32>
    %133 = arith.addf %131, %132 : vector<8x1xf32>
    %134 = math.rsqrt %133 : vector<8x1xf32>
    %135 = vector.broadcast %134 : vector<8x1xf32> to vector<8x32xf32>
    %136 = arith.mulf %126, %135 : vector<8x32xf32>
    %137 = vector.broadcast %41 : vector<1x32xf32> to vector<8x32xf32>
    %138 = arith.mulf %136, %137 : vector<8x32xf32>
    %139 = vector.broadcast %42 : vector<1x32xf32> to vector<8x32xf32>
    %140 = arith.addf %138, %139 : vector<8x32xf32>
    %cst_40 = arith.constant dense<0.000000e+00> : vector<8x64xf32>
    %141 = tpu.matmul %140, %35, %cst_40 {dimension_numbers = #tpu.dot_dimension_numbers<[1], [0], [0], [1], [0, 0, 1, 1], [], []>} : vector<8x32xf32>, vector<32x64xf32>, vector<8x64xf32> -> vector<8x64xf32>
    %142 = vector.broadcast %39 : vector<1x64xf32> to vector<8x64xf32>
    %143 = arith.addf %141, %142 : vector<8x64xf32>
    %144 = arith.mulf %143, %143 : vector<8x64xf32>
    %145 = arith.mulf %143, %144 : vector<8x64xf32>
    %cst_41 = arith.constant 4.471500e-02 : f32
    %146 = vector.broadcast %cst_41 : f32 to vector<8x64xf32>
    %147 = arith.mulf %146, %145 : vector<8x64xf32>
    %148 = arith.addf %143, %147 : vector<8x64xf32>
    %cst_42 = arith.constant 0.797884583 : f32
    %149 = vector.broadcast %cst_42 : f32 to vector<8x64xf32>
    %150 = arith.mulf %149, %148 : vector<8x64xf32>
    %151 = math.tanh %150 : vector<8x64xf32>
    %cst_43 = arith.constant 1.000000e+00 : f32
    %152 = vector.broadcast %cst_43 : f32 to vector<8x64xf32>
    %153 = arith.addf %152, %151 : vector<8x64xf32>
    %cst_44 = arith.constant 5.000000e-01 : f32
    %154 = vector.broadcast %cst_44 : f32 to vector<8x64xf32>
    %155 = arith.mulf %154, %153 : vector<8x64xf32>
    %156 = arith.mulf %143, %155 : vector<8x64xf32>
    %cst_45 = arith.constant dense<0.000000e+00> : vector<8x32xf32>
    %157 = tpu.matmul %156, %36, %cst_45 {dimension_numbers = #tpu.dot_dimension_numbers<[1], [1], [0], [0], [0, 0, 1, 0], [], []>} : vector<8x64xf32>, vector<32x64xf32>, vector<8x32xf32> -> vector<8x32xf32>
    %158 = vector.broadcast %40 : vector<1x32xf32> to vector<8x32xf32>
    %159 = arith.addf %157, %158 : vector<8x32xf32>
    %160 = arith.addf %140, %159 : vector<8x32xf32>
    %cst_46 = arith.constant dense<0.000000e+00> : vector<8xf32>
    %161 = vector.multi_reduction <add>, %160, %cst_46 [1] : vector<8x32xf32> to vector<8xf32>
    %162 = vector.shape_cast %161 : vector<8xf32> to vector<8x1xf32>
    %cst_47 = arith.constant 3.200000e+01 : f32
    %163 = vector.broadcast %cst_47 : f32 to vector<8x1xf32>
    %164 = arith.divf %162, %163 : vector<8x1xf32>
    %165 = vector.broadcast %164 : vector<8x1xf32> to vector<8x32xf32>
    %166 = arith.subf %160, %165 : vector<8x32xf32>
    %167 = arith.mulf %166, %166 : vector<8x32xf32>
    %cst_48 = arith.constant dense<0.000000e+00> : vector<8xf32>
    %168 = vector.multi_reduction <add>, %167, %cst_48 [1] : vector<8x32xf32> to vector<8xf32>
    %169 = vector.shape_cast %168 : vector<8xf32> to vector<8x1xf32>
    %cst_49 = arith.constant 3.200000e+01 : f32
    %170 = vector.broadcast %cst_49 : f32 to vector<8x1xf32>
    %171 = arith.divf %169, %170 : vector<8x1xf32>
    %cst_50 = arith.constant 9.99999996E-13 : f32
    %172 = vector.broadcast %cst_50 : f32 to vector<8x1xf32>
    %173 = arith.addf %171, %172 : vector<8x1xf32>
    %174 = math.rsqrt %173 : vector<8x1xf32>
    %175 = vector.broadcast %174 : vector<8x1xf32> to vector<8x32xf32>
    %176 = arith.mulf %166, %175 : vector<8x32xf32>
    %177 = vector.broadcast %43 : vector<1x32xf32> to vector<8x32xf32>
    %178 = arith.mulf %176, %177 : vector<8x32xf32>
    %179 = vector.broadcast %44 : vector<1x32xf32> to vector<8x32xf32>
    %180 = arith.addf %178, %179 : vector<8x32xf32>
    %c1 = arith.constant 1 : index
    %c0_51 = arith.constant 0 : index
    %c0_52 = arith.constant 0 : index
    %181 = vector.load %arg3[%c1, %c0_51, %c0_52] : memref<2x32x256xf32, #tpu.memory_space<vmem>>, vector<1x32x256xf32>
    %182 = vector.shape_cast %181 : vector<1x32x256xf32> to vector<32x256xf32>
    %c1_53 = arith.constant 1 : index
    %c0_54 = arith.constant 0 : index
    %c0_55 = arith.constant 0 : index
    %183 = vector.load %arg4[%c1_53, %c0_54, %c0_55] : memref<2x8x96xf32, #tpu.memory_space<vmem>>, vector<1x8x96xf32>
    %184 = vector.shape_cast %183 : vector<1x8x96xf32> to vector<8x96xf32>
    %185 = vector.extract_strided_slice %182 {offsets = [0, 0], sizes = [32, 96], strides = [1, 1]} : vector<32x256xf32> to vector<32x96xf32>
    %186 = vector.extract_strided_slice %182 {offsets = [0, 96], sizes = [32, 32], strides = [1, 1]} : vector<32x256xf32> to vector<32x32xf32>
    %187 = vector.extract_strided_slice %182 {offsets = [0, 128], sizes = [32, 64], strides = [1, 1]} : vector<32x256xf32> to vector<32x64xf32>
    %188 = vector.extract_strided_slice %182 {offsets = [0, 192], sizes = [32, 64], strides = [1, 1]} : vector<32x256xf32> to vector<32x64xf32>
    %189 = vector.extract_strided_slice %184 {offsets = [0, 0], sizes = [1, 96], strides = [1, 1]} : vector<8x96xf32> to vector<1x96xf32>
    %190 = vector.extract_strided_slice %184 {offsets = [1, 0], sizes = [1, 32], strides = [1, 1]} : vector<8x96xf32> to vector<1x32xf32>
    %191 = vector.extract_strided_slice %184 {offsets = [2, 0], sizes = [1, 64], strides = [1, 1]} : vector<8x96xf32> to vector<1x64xf32>
    %192 = vector.extract_strided_slice %184 {offsets = [3, 0], sizes = [1, 32], strides = [1, 1]} : vector<8x96xf32> to vector<1x32xf32>
    %193 = vector.extract_strided_slice %184 {offsets = [4, 0], sizes = [1, 32], strides = [1, 1]} : vector<8x96xf32> to vector<1x32xf32>
    %194 = vector.extract_strided_slice %184 {offsets = [5, 0], sizes = [1, 32], strides = [1, 1]} : vector<8x96xf32> to vector<1x32xf32>
    %195 = vector.extract_strided_slice %184 {offsets = [6, 0], sizes = [1, 32], strides = [1, 1]} : vector<8x96xf32> to vector<1x32xf32>
    %196 = vector.extract_strided_slice %184 {offsets = [7, 0], sizes = [1, 32], strides = [1, 1]} : vector<8x96xf32> to vector<1x32xf32>
    %cst_56 = arith.constant dense<0.000000e+00> : vector<8x96xf32>
    %197 = tpu.matmul %180, %185, %cst_56 {dimension_numbers = #tpu.dot_dimension_numbers<[1], [0], [0], [1], [0, 0, 1, 1], [], []>} : vector<8x32xf32>, vector<32x96xf32>, vector<8x96xf32> -> vector<8x96xf32>
    %198 = vector.broadcast %189 : vector<1x96xf32> to vector<8x96xf32>
    %199 = arith.addf %197, %198 : vector<8x96xf32>
    %200 = vector.extract_strided_slice %199 {offsets = [0, 0], sizes = [8, 8], strides = [1, 1]} : vector<8x96xf32> to vector<8x8xf32>
    %201 = vector.extract_strided_slice %199 {offsets = [0, 32], sizes = [8, 8], strides = [1, 1]} : vector<8x96xf32> to vector<8x8xf32>
    %202 = vector.extract_strided_slice %199 {offsets = [0, 64], sizes = [8, 8], strides = [1, 1]} : vector<8x96xf32> to vector<8x8xf32>
    %cst_57 = arith.constant dense<0.000000e+00> : vector<8x8xf32>
    %203 = tpu.matmul %200, %201, %cst_57 {dimension_numbers = #tpu.dot_dimension_numbers<[1], [1], [0], [0], [0, 0, 1, 0], [], []>} : vector<8x8xf32>, vector<8x8xf32>, vector<8x8xf32> -> vector<8x8xf32>
    %204 = vector.broadcast %28 : vector<1x8xf32> to vector<8x8xf32>
    %205 = arith.addf %203, %204 : vector<8x8xf32>
    %cst_58 = arith.constant dense<0xFF800000> : vector<8xf32>
    %206 = vector.multi_reduction <maximumf>, %205, %cst_58 [1] : vector<8x8xf32> to vector<8xf32>
    %207 = vector.shape_cast %206 : vector<8xf32> to vector<8x1xf32>
    %208 = vector.broadcast %207 : vector<8x1xf32> to vector<8x8xf32>
    %209 = arith.subf %205, %208 : vector<8x8xf32>
    %210 = math.exp %209 : vector<8x8xf32>
    %cst_59 = arith.constant dense<0.000000e+00> : vector<8xf32>
    %211 = vector.multi_reduction <add>, %210, %cst_59 [1] : vector<8x8xf32> to vector<8xf32>
    %212 = vector.shape_cast %211 : vector<8xf32> to vector<8x1xf32>
    %213 = tpu.reciprocal %212 {approx = true} : vector<8x1xf32> -> vector<8x1xf32>
    %214 = vector.broadcast %213 : vector<8x1xf32> to vector<8x8xf32>
    %215 = arith.mulf %210, %214 : vector<8x8xf32>
    %cst_60 = arith.constant dense<0.000000e+00> : vector<8x8xf32>
    %216 = tpu.matmul %215, %202, %cst_60 {dimension_numbers = #tpu.dot_dimension_numbers<[1], [0], [0], [1], [0, 0, 1, 1], [], []>} : vector<8x8xf32>, vector<8x8xf32>, vector<8x8xf32> -> vector<8x8xf32>
    %217 = vector.extract_strided_slice %199 {offsets = [0, 8], sizes = [8, 8], strides = [1, 1]} : vector<8x96xf32> to vector<8x8xf32>
    %218 = vector.extract_strided_slice %199 {offsets = [0, 40], sizes = [8, 8], strides = [1, 1]} : vector<8x96xf32> to vector<8x8xf32>
    %219 = vector.extract_strided_slice %199 {offsets = [0, 72], sizes = [8, 8], strides = [1, 1]} : vector<8x96xf32> to vector<8x8xf32>
    %cst_61 = arith.constant dense<0.000000e+00> : vector<8x8xf32>
    %220 = tpu.matmul %217, %218, %cst_61 {dimension_numbers = #tpu.dot_dimension_numbers<[1], [1], [0], [0], [0, 0, 1, 0], [], []>} : vector<8x8xf32>, vector<8x8xf32>, vector<8x8xf32> -> vector<8x8xf32>
    %221 = vector.broadcast %28 : vector<1x8xf32> to vector<8x8xf32>
    %222 = arith.addf %220, %221 : vector<8x8xf32>
    %cst_62 = arith.constant dense<0xFF800000> : vector<8xf32>
    %223 = vector.multi_reduction <maximumf>, %222, %cst_62 [1] : vector<8x8xf32> to vector<8xf32>
    %224 = vector.shape_cast %223 : vector<8xf32> to vector<8x1xf32>
    %225 = vector.broadcast %224 : vector<8x1xf32> to vector<8x8xf32>
    %226 = arith.subf %222, %225 : vector<8x8xf32>
    %227 = math.exp %226 : vector<8x8xf32>
    %cst_63 = arith.constant dense<0.000000e+00> : vector<8xf32>
    %228 = vector.multi_reduction <add>, %227, %cst_63 [1] : vector<8x8xf32> to vector<8xf32>
    %229 = vector.shape_cast %228 : vector<8xf32> to vector<8x1xf32>
    %230 = tpu.reciprocal %229 {approx = true} : vector<8x1xf32> -> vector<8x1xf32>
    %231 = vector.broadcast %230 : vector<8x1xf32> to vector<8x8xf32>
    %232 = arith.mulf %227, %231 : vector<8x8xf32>
    %cst_64 = arith.constant dense<0.000000e+00> : vector<8x8xf32>
    %233 = tpu.matmul %232, %219, %cst_64 {dimension_numbers = #tpu.dot_dimension_numbers<[1], [0], [0], [1], [0, 0, 1, 1], [], []>} : vector<8x8xf32>, vector<8x8xf32>, vector<8x8xf32> -> vector<8x8xf32>
    %234 = vector.extract_strided_slice %199 {offsets = [0, 16], sizes = [8, 8], strides = [1, 1]} : vector<8x96xf32> to vector<8x8xf32>
    %235 = vector.extract_strided_slice %199 {offsets = [0, 48], sizes = [8, 8], strides = [1, 1]} : vector<8x96xf32> to vector<8x8xf32>
    %236 = vector.extract_strided_slice %199 {offsets = [0, 80], sizes = [8, 8], strides = [1, 1]} : vector<8x96xf32> to vector<8x8xf32>
    %cst_65 = arith.constant dense<0.000000e+00> : vector<8x8xf32>
    %237 = tpu.matmul %234, %235, %cst_65 {dimension_numbers = #tpu.dot_dimension_numbers<[1], [1], [0], [0], [0, 0, 1, 0], [], []>} : vector<8x8xf32>, vector<8x8xf32>, vector<8x8xf32> -> vector<8x8xf32>
    %238 = vector.broadcast %28 : vector<1x8xf32> to vector<8x8xf32>
    %239 = arith.addf %237, %238 : vector<8x8xf32>
    %cst_66 = arith.constant dense<0xFF800000> : vector<8xf32>
    %240 = vector.multi_reduction <maximumf>, %239, %cst_66 [1] : vector<8x8xf32> to vector<8xf32>
    %241 = vector.shape_cast %240 : vector<8xf32> to vector<8x1xf32>
    %242 = vector.broadcast %241 : vector<8x1xf32> to vector<8x8xf32>
    %243 = arith.subf %239, %242 : vector<8x8xf32>
    %244 = math.exp %243 : vector<8x8xf32>
    %cst_67 = arith.constant dense<0.000000e+00> : vector<8xf32>
    %245 = vector.multi_reduction <add>, %244, %cst_67 [1] : vector<8x8xf32> to vector<8xf32>
    %246 = vector.shape_cast %245 : vector<8xf32> to vector<8x1xf32>
    %247 = tpu.reciprocal %246 {approx = true} : vector<8x1xf32> -> vector<8x1xf32>
    %248 = vector.broadcast %247 : vector<8x1xf32> to vector<8x8xf32>
    %249 = arith.mulf %244, %248 : vector<8x8xf32>
    %cst_68 = arith.constant dense<0.000000e+00> : vector<8x8xf32>
    %250 = tpu.matmul %249, %236, %cst_68 {dimension_numbers = #tpu.dot_dimension_numbers<[1], [0], [0], [1], [0, 0, 1, 1], [], []>} : vector<8x8xf32>, vector<8x8xf32>, vector<8x8xf32> -> vector<8x8xf32>
    %251 = vector.extract_strided_slice %199 {offsets = [0, 24], sizes = [8, 8], strides = [1, 1]} : vector<8x96xf32> to vector<8x8xf32>
    %252 = vector.extract_strided_slice %199 {offsets = [0, 56], sizes = [8, 8], strides = [1, 1]} : vector<8x96xf32> to vector<8x8xf32>
    %253 = vector.extract_strided_slice %199 {offsets = [0, 88], sizes = [8, 8], strides = [1, 1]} : vector<8x96xf32> to vector<8x8xf32>
    %cst_69 = arith.constant dense<0.000000e+00> : vector<8x8xf32>
    %254 = tpu.matmul %251, %252, %cst_69 {dimension_numbers = #tpu.dot_dimension_numbers<[1], [1], [0], [0], [0, 0, 1, 0], [], []>} : vector<8x8xf32>, vector<8x8xf32>, vector<8x8xf32> -> vector<8x8xf32>
    %255 = vector.broadcast %28 : vector<1x8xf32> to vector<8x8xf32>
    %256 = arith.addf %254, %255 : vector<8x8xf32>
    %cst_70 = arith.constant dense<0xFF800000> : vector<8xf32>
    %257 = vector.multi_reduction <maximumf>, %256, %cst_70 [1] : vector<8x8xf32> to vector<8xf32>
    %258 = vector.shape_cast %257 : vector<8xf32> to vector<8x1xf32>
    %259 = vector.broadcast %258 : vector<8x1xf32> to vector<8x8xf32>
    %260 = arith.subf %256, %259 : vector<8x8xf32>
    %261 = math.exp %260 : vector<8x8xf32>
    %cst_71 = arith.constant dense<0.000000e+00> : vector<8xf32>
    %262 = vector.multi_reduction <add>, %261, %cst_71 [1] : vector<8x8xf32> to vector<8xf32>
    %263 = vector.shape_cast %262 : vector<8xf32> to vector<8x1xf32>
    %264 = tpu.reciprocal %263 {approx = true} : vector<8x1xf32> -> vector<8x1xf32>
    %265 = vector.broadcast %264 : vector<8x1xf32> to vector<8x8xf32>
    %266 = arith.mulf %261, %265 : vector<8x8xf32>
    %cst_72 = arith.constant dense<0.000000e+00> : vector<8x8xf32>
    %267 = tpu.matmul %266, %253, %cst_72 {dimension_numbers = #tpu.dot_dimension_numbers<[1], [0], [0], [1], [0, 0, 1, 1], [], []>} : vector<8x8xf32>, vector<8x8xf32>, vector<8x8xf32> -> vector<8x8xf32>
    %268 = tpu.concatenate %216, %233, %250, %267 in 1 : vector<8x8xf32>, vector<8x8xf32>, vector<8x8xf32>, vector<8x8xf32> -> vector<8x32xf32>
    %cst_73 = arith.constant dense<0.000000e+00> : vector<8x32xf32>
    %269 = tpu.matmul %268, %186, %cst_73 {dimension_numbers = #tpu.dot_dimension_numbers<[1], [0], [0], [1], [0, 0, 1, 1], [], []>} : vector<8x32xf32>, vector<32x32xf32>, vector<8x32xf32> -> vector<8x32xf32>
    %270 = vector.broadcast %190 : vector<1x32xf32> to vector<8x32xf32>
    %271 = arith.addf %269, %270 : vector<8x32xf32>
    %272 = arith.addf %180, %271 : vector<8x32xf32>
    %cst_74 = arith.constant dense<0.000000e+00> : vector<8xf32>
    %273 = vector.multi_reduction <add>, %272, %cst_74 [1] : vector<8x32xf32> to vector<8xf32>
    %274 = vector.shape_cast %273 : vector<8xf32> to vector<8x1xf32>
    %cst_75 = arith.constant 3.200000e+01 : f32
    %275 = vector.broadcast %cst_75 : f32 to vector<8x1xf32>
    %276 = arith.divf %274, %275 : vector<8x1xf32>
    %277 = vector.broadcast %276 : vector<8x1xf32> to vector<8x32xf32>
    %278 = arith.subf %272, %277 : vector<8x32xf32>
    %279 = arith.mulf %278, %278 : vector<8x32xf32>
    %cst_76 = arith.constant dense<0.000000e+00> : vector<8xf32>
    %280 = vector.multi_reduction <add>, %279, %cst_76 [1] : vector<8x32xf32> to vector<8xf32>
    %281 = vector.shape_cast %280 : vector<8xf32> to vector<8x1xf32>
    %cst_77 = arith.constant 3.200000e+01 : f32
    %282 = vector.broadcast %cst_77 : f32 to vector<8x1xf32>
    %283 = arith.divf %281, %282 : vector<8x1xf32>
    %cst_78 = arith.constant 9.99999996E-13 : f32
    %284 = vector.broadcast %cst_78 : f32 to vector<8x1xf32>
    %285 = arith.addf %283, %284 : vector<8x1xf32>
    %286 = math.rsqrt %285 : vector<8x1xf32>
    %287 = vector.broadcast %286 : vector<8x1xf32> to vector<8x32xf32>
    %288 = arith.mulf %278, %287 : vector<8x32xf32>
    %289 = vector.broadcast %193 : vector<1x32xf32> to vector<8x32xf32>
    %290 = arith.mulf %288, %289 : vector<8x32xf32>
    %291 = vector.broadcast %194 : vector<1x32xf32> to vector<8x32xf32>
    %292 = arith.addf %290, %291 : vector<8x32xf32>
    %cst_79 = arith.constant dense<0.000000e+00> : vector<8x64xf32>
    %293 = tpu.matmul %292, %187, %cst_79 {dimension_numbers = #tpu.dot_dimension_numbers<[1], [0], [0], [1], [0, 0, 1, 1], [], []>} : vector<8x32xf32>, vector<32x64xf32>, vector<8x64xf32> -> vector<8x64xf32>
    %294 = vector.broadcast %191 : vector<1x64xf32> to vector<8x64xf32>
    %295 = arith.addf %293, %294 : vector<8x64xf32>
    %296 = arith.mulf %295, %295 : vector<8x64xf32>
    %297 = arith.mulf %295, %296 : vector<8x64xf32>
    %cst_80 = arith.constant 4.471500e-02 : f32
    %298 = vector.broadcast %cst_80 : f32 to vector<8x64xf32>
    %299 = arith.mulf %298, %297 : vector<8x64xf32>
    %300 = arith.addf %295, %299 : vector<8x64xf32>
    %cst_81 = arith.constant 0.797884583 : f32
    %301 = vector.broadcast %cst_81 : f32 to vector<8x64xf32>
    %302 = arith.mulf %301, %300 : vector<8x64xf32>
    %303 = math.tanh %302 : vector<8x64xf32>
    %cst_82 = arith.constant 1.000000e+00 : f32
    %304 = vector.broadcast %cst_82 : f32 to vector<8x64xf32>
    %305 = arith.addf %304, %303 : vector<8x64xf32>
    %cst_83 = arith.constant 5.000000e-01 : f32
    %306 = vector.broadcast %cst_83 : f32 to vector<8x64xf32>
    %307 = arith.mulf %306, %305 : vector<8x64xf32>
    %308 = arith.mulf %295, %307 : vector<8x64xf32>
    %cst_84 = arith.constant dense<0.000000e+00> : vector<8x32xf32>
    %309 = tpu.matmul %308, %188, %cst_84 {dimension_numbers = #tpu.dot_dimension_numbers<[1], [1], [0], [0], [0, 0, 1, 0], [], []>} : vector<8x64xf32>, vector<32x64xf32>, vector<8x32xf32> -> vector<8x32xf32>
    %310 = vector.broadcast %192 : vector<1x32xf32> to vector<8x32xf32>
    %311 = arith.addf %309, %310 : vector<8x32xf32>
    %312 = arith.addf %292, %311 : vector<8x32xf32>
    %cst_85 = arith.constant dense<0.000000e+00> : vector<8xf32>
    %313 = vector.multi_reduction <add>, %312, %cst_85 [1] : vector<8x32xf32> to vector<8xf32>
    %314 = vector.shape_cast %313 : vector<8xf32> to vector<8x1xf32>
    %cst_86 = arith.constant 3.200000e+01 : f32
    %315 = vector.broadcast %cst_86 : f32 to vector<8x1xf32>
    %316 = arith.divf %314, %315 : vector<8x1xf32>
    %317 = vector.broadcast %316 : vector<8x1xf32> to vector<8x32xf32>
    %318 = arith.subf %312, %317 : vector<8x32xf32>
    %319 = arith.mulf %318, %318 : vector<8x32xf32>
    %cst_87 = arith.constant dense<0.000000e+00> : vector<8xf32>
    %320 = vector.multi_reduction <add>, %319, %cst_87 [1] : vector<8x32xf32> to vector<8xf32>
    %321 = vector.shape_cast %320 : vector<8xf32> to vector<8x1xf32>
    %cst_88 = arith.constant 3.200000e+01 : f32
    %322 = vector.broadcast %cst_88 : f32 to vector<8x1xf32>
    %323 = arith.divf %321, %322 : vector<8x1xf32>
    %cst_89 = arith.constant 9.99999996E-13 : f32
    %324 = vector.broadcast %cst_89 : f32 to vector<8x1xf32>
    %325 = arith.addf %323, %324 : vector<8x1xf32>
    %326 = math.rsqrt %325 : vector<8x1xf32>
    %327 = vector.broadcast %326 : vector<8x1xf32> to vector<8x32xf32>
    %328 = arith.mulf %318, %327 : vector<8x32xf32>
    %329 = vector.broadcast %195 : vector<1x32xf32> to vector<8x32xf32>
    %330 = arith.mulf %328, %329 : vector<8x32xf32>
    %331 = vector.broadcast %196 : vector<1x32xf32> to vector<8x32xf32>
    %332 = arith.addf %330, %331 : vector<8x32xf32>
    %c0_90 = arith.constant 0 : index
    %c0_91 = arith.constant 0 : index
    %333 = vector.load %arg5[%c0_90, %c0_91] : memref<32x160xf32, #tpu.memory_space<vmem>>, vector<32x160xf32>
    %334 = vector.extract_strided_slice %332 {offsets = [0, 0], sizes = [1, 32], strides = [1, 1]} : vector<8x32xf32> to vector<1x32xf32>
    %335 = vector.extract_strided_slice %333 {offsets = [0, 0], sizes = [32, 32], strides = [1, 1]} : vector<32x160xf32> to vector<32x32xf32>
    %cst_92 = arith.constant dense<0.000000e+00> : vector<1x32xf32>
    %336 = tpu.matmul %334, %335, %cst_92 {dimension_numbers = #tpu.dot_dimension_numbers<[1], [0], [0], [1], [0, 0, 1, 1], [], []>} : vector<1x32xf32>, vector<32x32xf32>, vector<1x32xf32> -> vector<1x32xf32>
    %337 = arith.addf %336, %3 : vector<1x32xf32>
    %338 = math.tanh %337 : vector<1x32xf32>
    %339 = vector.extract_strided_slice %333 {offsets = [0, 32], sizes = [32, 128], strides = [1, 1]} : vector<32x160xf32> to vector<32x128xf32>
    %cst_93 = arith.constant dense<0.000000e+00> : vector<1x128xf32>
    %340 = tpu.matmul %338, %339, %cst_93 {dimension_numbers = #tpu.dot_dimension_numbers<[1], [0], [0], [1], [0, 0, 1, 1], [], []>} : vector<1x32xf32>, vector<32x128xf32>, vector<1x128xf32> -> vector<1x128xf32>
    %341 = arith.addf %340, %4 : vector<1x128xf32>
    %c0_94 = arith.constant 0 : index
    %c0_95 = arith.constant 0 : index
    %c0_96 = arith.constant 0 : index
    %342 = vector.load %arg7[%c0_94, %c0_95, %c0_96] : memref<1x1x128xf32, #tpu.memory_space<vmem>>, vector<1x1x128xf32>
    %343 = vector.shape_cast %342 : vector<1x1x128xf32> to vector<1x128xf32>
    %344 = vector.shape_cast %341 : vector<1x128xf32> to vector<1x1x128xf32>
    tpu.vector_store %arg7[%c0_94, %c0_95, %c0_96], %344 {strides = array<i32>} : memref<1x1x128xf32, #tpu.memory_space<vmem>>, vector<1x1x128xf32>,
    return
  }
  func.func @transform_0(%arg0: i32) -> (i32, i32, i32) {
    %c0_i32 = arith.constant 0 : i32
    %c0_i32_0 = arith.constant 0 : i32
    %c0_i32_1 = arith.constant 0 : i32
    return %arg0, %c0_i32, %c0_i32_0 : i32, i32, i32
  }
  func.func @transform_1(%arg0: i32) -> (i32, i32, i32) {
    %c0_i32 = arith.constant 0 : i32
    %c0_i32_0 = arith.constant 0 : i32
    %c0_i32_1 = arith.constant 0 : i32
    return %arg0, %c0_i32, %c0_i32_0 : i32, i32, i32
  }
  func.func @transform_2(%arg0: i32) -> (i32, i32, i32) {
    %c0_i32 = arith.constant 0 : i32
    %c0_i32_0 = arith.constant 0 : i32
    %c0_i32_1 = arith.constant 0 : i32
    %c0_i32_2 = arith.constant 0 : i32
    return %c0_i32, %c0_i32_0, %c0_i32_1 : i32, i32, i32
  }
  func.func @transform_3(%arg0: i32) -> (i32, i32, i32) {
    %c0_i32 = arith.constant 0 : i32
    %c0_i32_0 = arith.constant 0 : i32
    %c0_i32_1 = arith.constant 0 : i32
    %c0_i32_2 = arith.constant 0 : i32
    return %c0_i32, %c0_i32_0, %c0_i32_1 : i32, i32, i32
  }
  func.func @transform_4(%arg0: i32) -> (i32, i32) {
    %c0_i32 = arith.constant 0 : i32
    %c0_i32_0 = arith.constant 0 : i32
    %c0_i32_1 = arith.constant 0 : i32
    return %c0_i32, %c0_i32_0 : i32, i32
  }
  func.func @transform_5(%arg0: i32) -> (i32, i32) {
    %c0_i32 = arith.constant 0 : i32
    %c0_i32_0 = arith.constant 0 : i32
    %c0_i32_1 = arith.constant 0 : i32
    return %c0_i32, %c0_i32_0 : i32, i32
  }
  func.func @transform_6(%arg0: i32) -> (i32, i32, i32) {
    %c0_i32 = arith.constant 0 : i32
    %c0_i32_0 = arith.constant 0 : i32
    %c0_i32_1 = arith.constant 0 : i32
    return %arg0, %c0_i32, %c0_i32_0 : i32, i32, i32
  }
}

</mosaic_0001>

<bundles_post_ra>
// kernel: bert_forward.1
= control target key start
LH: loop header
LB: loop body
LE: loop exit
PB: predicated region body
PF: predicated region fallthrough
CT: control target
= control target key end

     0   :  { %11 = vsyncpa [#allocation3], 0  ;;  %s3855_s0 = inlined_call_operand.vmem [shape: f32[2,8,32], index: 0, kind: input, shape index: {}]   ;;  %s3856_s1 = inlined_call_operand.vmem [shape: f32[2,1,8], index: 1, kind: input, shape index: {}]   ;;  %s3857_s2 = inlined_call_operand.vmem [shape: f32[2,32,256], index: 2, kind: input, shape index: {}]   ;;  %s3858_s3 = inlined_call_operand.vmem [shape: f32[2,8,96], index: 3, kind: input, shape index: {}]   ;;  %s3859_s4 = inlined_call_operand.vmem [shape: f32[32,160], index: 4, kind: input, shape index: {}]   ;;  %s3860_s5 = inlined_call_operand.vmem [shape: f32[4,128], index: 5, kind: input, shape index: {}]   ;;  %s3861_s6 = inlined_call_operand.hbm [shape: f32[2,1,128], index: 6, kind: output, shape index: {}]  }
   0x1   :  { %13 = vsyncpa [#allocation3 + $0x1], 0  ;;  %s3291_s21 = smov 0   ;;  %s3293_s22 = smov 0  }
   0x2   :  { %s3295_s23 = smov 0   ;;  %s3297_s24 = smov 0  }
   0x3 LB: > { %s3312_s25 = sadd.s32 4294967295, %s3236_s24   ;;  %s2739_s26 = sadd.s32 4294967294, %s3236_s24   ;;  %s3236_s24 = sphi %s3297_s24, %s3880_s24   ;;  %s3232_s23 = sphi %s3295_s23, %s3879_s23   ;;  %s3228_s22 = sphi %s3293_s22, %s3878_s22   ;;  %s3224_s21 = sphi %s3291_s21, %s3877_s21  }
   0x4   : > { %s3316_s27 = sadd.s32 1, %s3236_s24   ;;  %s162_s28 = sadd.s32 1, %s3232_s23 }
   0x5   : > { %s159_s29 = ssub.s32 %s3236_s24, %s3316_s27  ;;  %p172_p0 = scmp.ne.s32.totalorder %s3232_s23, %s3228_s22 }
   0x6   : > { %p160_p1 = scmp.eq.s32.totalorder %s159_s29, 0  ;;  %p173_p2 = scmp.eq.s32.totalorder %s3312_s25, 1 }
   0x7   : > { %p178_p3 = scmp.ne.s32.totalorder %s3228_s22, %s3224_s21  ;;  %p179_p4 = scmp.eq.s32.totalorder %s2739_s26, 1 }
   0x8   : > { %s3327_s30 = scalar_select %p160_p1, %s3232_s23, %s162_s28  }
   0x9   : > { %p3329_p5 = por %p173_p2, %p172_p0  ;;  %p3333_p6 = por %p179_p4, %p178_p3 }
   0xa   : > { %p2742_p7 = scmp.ge.s32.totalorder %s3236_s24, 1  ;;  %p222_p8 = scmp.lt.s32.totalorder %s3236_s24, 3 }
   0xc   : > { %p223_p9 = pnand %p2742_p7, %p222_p8 }
   0xd   : > { %p253_p10 = scmp.lt.s32.totalorder (!%p223_p9), %s3312_s25, 1  ;;  %s3240_s12 = smov (!%p223_p9), 120  }
   0xe   : > { %226 = sbr.rel (%p223_p9) target bundleno = 5506 (0x1582), region = 44  ;;  %s3242_s14 = smov (!%p223_p9), 88  }
   0xf   : > { %s3243_s15 = smov (!%p223_p9), 80   ;;  %s3244_s16 = smov (!%p223_p9), 112  }
  0x10   : > { %s3245_s17 = smov (!%p223_p9), 72   ;;  %s3246_s18 = smov (!%p223_p9), 104  }
  0x11   : > { %s3248_s28 = smov (!%p223_p9), 48   ;;  %s3868_s29 = smov (!%p223_p9), 40  }
  0x12   : > { %s3866_s11 = smov (!%p223_p9), 32   ;;  %s3864_s19 = smov (!%p223_p9), 8  }
  0x13   : > { %s3341_s9 = scalar_select %p253_p10, %s3312_s25, 1  ;;  %vm262_vm0 = vcmask 261120   ;;  %v3352_v7 = vld [vmem:[%s3857_s2 + $0x30] sm:$0xff]  ;;  %v3238_v8 = vmov 0.0   ;;  %v3358_v9 = vld [vmem:[%s3857_s2 + $0x20] sm:$0xff]  ;;  %vm3239_vm1 = vmmov 0   ;;  %v277_v15 = vlaneseq }
  0x14   : > { %2881 = vmatprep.subr.mxu0 %v3238_v8  ;;  %2889 = vmatprep.mubr.msk.f32.mxu0 %vm3239_vm1, %v3238_v8  ;;  %v3368_v10 = vld [vmem:[%s3857_s2 + $0x10] sm:$0xff]  ;;  %v3377_v11 = vld [vmem:[%s3857_s2] sm:$0xff]  ;;  %vm383_vm2 = vcmask 64512   ;;  %s3863_s20 = smov 16   ;;  %vm1053_vm3 = vcmask 130048   ;;  %vm1055_vm4 = vcmask 195584  }
  0x15   : > { %s2743_s10 = sshll.u32 %s3341_s9, 3  ;;  %2882 = vmatpush3.msra.mxu0 %v3352_v7  ;;  %2892 = vmatprep.subr.mxu1 %v3238_v8  ;;  %v3383_v16 = vshrl.u32 %v277_v15, 7  ;;  %v260_v18 = vld [vmem:[%s3860_s5] sm:$0xf]  ;;  %s259_s26 = scalar_lea.vmem %s3856_s1, %s3341_s9  ;;  %vm1276_vm5 = vcmask 523264   ;;  %vm2577_vm6 = vcmask 785408  }
  0x16   : > { %s256_s13 = scalar_lea.vmem %s3855_s0, %s2743_s10  ;;  %2883 = vmatprep.subr.mxu0 %v3238_v8  ;;  %2894 = vmatprep.mubr.msk.f32.mxu1 %vm3239_vm1, %v3238_v8  ;;  %v3405_v26 = vld [vmem:[%s3858_s3] sm:$0xff]  ;;  %s3247_s9 = smov 64  }
  0x17   : > { %v261_v0 = vld [vmem:[%s256_s13] sm:$0xff]  ;;  %2884 = vmatpush3.msra.mxu0 %v3358_v9  ;;  %v3386_v17 = vsub.s32 0, %v3383_v16  ;;  %v3392_v19 = vsub.s32 1, %v3383_v16  ;;  %s3241_s13 = smov 96   ;;  %s3865_s10 = smov 56  }
  0x18   : > { %v263_v1 = vsel %vm262_vm0, %v261_v0, 0.0  ;;  %2885 = vmatprep.subr.mxu0 %v3238_v8  ;;  %v3450_v38 = vld [vmem:[%s259_s26] ss:$0 sm:$0xff]  ;;  %s3862_s26 = smov 24  }
  0x19   : > { %264 = vadd.xlane.f32.xlu0 %v263_v1  ;;  %2886 = vmatpush3.msra.mxu0 %v3368_v10  ;;  %v280_v20 = vrot.slane %v260_v18, %v3386_v17  ;;  %v285_v23 = vrot.slane %v260_v18, %v3392_v19  ;;  %v300_v27 = vrot.slane %v3405_v26, %v3386_v17 }
  0x1a   : > { %2887 = vmatprep.subr.mxu0 %v3238_v8 }
  0x1b   : > { %2888 = vmatpush3.msra.mxu0 %v3377_v11 }
  0x1c   : > { %2902 = vmatprep.subr.mxu0 %v3238_v8 }
  0xa2   : > { %v265_v2 = vpop.xlane.xlu0 %264 }
  0xa3   : > { %v267_v3 = vmul.f32 0.03125, %v265_v2 }
  0xa5   : > { %v268_v4 = vsub.f32 %v261_v0, %v267_v3 }
  0xa7   : > { %v269_v5 = vmul.f32 %v268_v4, %v268_v4 }
  0xa9   : > { %v270_v6 = vsel %vm262_vm0, %v269_v5, 0.0 }
  0xaa   : > { %271 = vadd.xlane.f32.xlu0 %v270_v6 }
 0x133   : > { %v272_v12 = vpop.xlane.xlu0 %271 }
 0x134   : > { %v273_v13 = vmul.f32 0.03125, %v272_v12 }
 0x136   : > { %v274_v14 = vadd.f32 1e-12, %v273_v13 }
 0x138   : > { %3127 = vrsqrt.f32 %v274_v14 }
 0x145   : > { %v3128_v21 = vpop.eup %3127 }
 0x146   : > { %v276_v22 = vmul.f32 %v3128_v21, %v268_v4 }
 0x148   : > { %v281_v24 = vmul.f32 %v280_v20, %v276_v22 }
 0x14a   : > { %v3396_v25 = vadd.f32 %v285_v23, %v281_v24 }
 0x14c   : > { %2890 = vmatmul.mubr.msk.f32.vlgmr.msra.gmra.mxu0 %vm262_vm0, %v3396_v25 }
 0x14d   : > { %2904 = vmatprep.mubr.msk.f32.mxu0 %vm3239_vm1, %v3238_v8 }
 0x20c   : > { %v370_v28 = vpop.f32.mrf.mxu0 }
 0x20d   : > { %v3409_v29 = vadd.f32 %v370_v28, %v300_v27 }
 0x20e   : > { %v2891_v30 = vpop.f32.mrf.mxu0 }
 0x20f   : > { %545 = vrot.lane.b32.xlu0 %v3409_v29, %s3240_s12  ;;  %381 = vrot.lane.b32.xlu1 %v3409_v29, %s3241_s13 }
 0x213   : > { %547 = vrot.lane.b32.xlu1 %v3409_v29, %s3242_s14 }
 0x217   : > { %712 = vrot.lane.b32.xlu1 %v3409_v29, %s3243_s15 }
 0x21b   : > { %710 = vrot.lane.b32.xlu1 %v3409_v29, %s3244_s16 }
 0x21f   : > { %877 = vrot.lane.b32.xlu1 %v3409_v29, %s3245_s17 }
 0x223   : > { %875 = vrot.lane.b32.xlu1 %v3409_v29, %s3246_s18 }
 0x281   : > { %v382_v31 = vpop.permute.xlu1 %381  ;;  %v546_v33 = vpop.permute.xlu0 %545 }
 0x282   : > { %2893 = vmatpush3.xpose.msk.msra.mxu1 %vm383_vm2, %v382_v31 }
 0x283   : > { %2897 = vmatprep.subr.mxu1 %v3238_v8 }
 0x285   : > { %2895 = vmatmul.mubr.msk.f32.vlgmr.msra.gmra.mxu1 %vm383_vm2, %v3409_v29  ;;  %v548_v32 = vpop.permute.xlu1 %547 }
 0x286   : > { %2903 = vmatpush3.xpose.msk.msra.mxu0 %vm383_vm2, %v548_v32  ;;  %2899 = vmatprep.mubr.msk.f32.mxu1 %vm3239_vm1, %v3238_v8 }
 0x287   : > { %2912 = vmatprep.subr.mxu0 %v3238_v8 }
 0x289   : > { %2905 = vmatmul.mubr.msk.f32.vlgmr.msra.gmra.mxu0 %vm383_vm2, %v546_v33  ;;  %v713_v34 = vpop.permute.xlu1 %712 }
 0x28a   : > { %2913 = vmatpush3.xpose.msk.msra.mxu0 %vm383_vm2, %v713_v34  ;;  %2914 = vmatprep.mubr.msk.f32.mxu0 %vm3239_vm1, %v3238_v8 }
 0x28b   : > { %2922 = vmatprep.subr.mxu0 %v3238_v8 }
 0x28d   : > { %v711_v35 = vpop.permute.xlu1 %710 }
 0x28e   : > { %2915 = vmatmul.mubr.msk.f32.vlgmr.msra.gmra.mxu0 %vm383_vm2, %v711_v35 }
 0x28f   : > { %2924 = vmatprep.mubr.msk.f32.mxu0 %vm3239_vm1, %v3238_v8 }
 0x291   : > { %v878_v36 = vpop.permute.xlu1 %877 }
 0x292   : > { %2923 = vmatpush3.xpose.msk.msra.mxu0 %vm383_vm2, %v878_v36 }
 0x293   : > { %2932 = vmatprep.subr.mxu0 %v3238_v8 }
 0x295   : > { %v876_v37 = vpop.permute.xlu1 %875 }
 0x296   : > { %2925 = vmatmul.mubr.msk.f32.vlgmr.msra.gmra.mxu0 %vm383_vm2, %v876_v37 }
 0x297   : > { %2940 = vmatprep.mubr.msk.f32.mxu0 %vm3239_vm1, %v3238_v8 }
 0x345   : > { %v454_v39 = vpop.f32.mrf.mxu1 }
 0x346   : > { %v455_v40 = vadd.f32 %v3450_v38, %v454_v39 }
 0x347   : > { %v2896_v41 = vpop.f32.mrf.mxu1 }
 0x348   : > { %v458_v42 = vsel %vm383_vm2, %v455_v40, -inf }
 0x349   : > { %459 = vmax.xlane.f32.xlu1 %v458_v42  ;;  %v619_v43 = vpop.f32.mrf.mxu0 }
 0x34a   : > { %v620_v44 = vadd.f32 %v3450_v38, %v619_v43 }
 0x34b   : > { %v2906_v45 = vpop.f32.mrf.mxu0 }
 0x34c   : > { %v623_v46 = vsel %vm383_vm2, %v620_v44, -inf }
 0x34d   : > { %624 = vmax.xlane.f32.xlu0 %v623_v46 }
 0x34e   : > { %v784_v47 = vpop.f32.mrf.mxu0 }
 0x34f   : > { %v785_v48 = vadd.f32 %v3450_v38, %v784_v47 }
 0x350   : > { %v2916_v49 = vpop.f32.mrf.mxu0 }
 0x351   : > { %v788_v50 = vsel %vm383_vm2, %v785_v48, -inf }
 0x352   : > { %789 = vmax.xlane.f32.xlu1 %v788_v50 }
 0x356   : > { %v949_v51 = vpop.f32.mrf.mxu0 }
 0x357   : > { %v950_v52 = vadd.f32 %v3450_v38, %v949_v51 }
 0x358   : > { %v2926_v53 = vpop.f32.mrf.mxu0 }
 0x359   : > { %v953_v54 = vsel %vm383_vm2, %v950_v52, -inf }
 0x35a   : > { %954 = vmax.xlane.f32.xlu0 %v953_v54 }
 0x363   : > { %469 = vrot.lane.b32.xlu1 %v3409_v29, %s3247_s9 }
 0x3d2   : > { %v460_v55 = vpop.xlane.xlu1 %459 }
 0x3d3   : > { %v461_v56 = vsub.f32 %v455_v40, %v460_v55 }
 0x3d5   : > { %v462_v57 = vmul.f32 1.442695, %v461_v56 }
 0x3d6   : > { %v625_v58 = vpop.xlane.xlu0 %624 }
 0x3d7   : > { %3129 = vpow2.f32 %v462_v57  ;;  %v626_v59 = vsub.f32 %v620_v44, %v625_v58 }
 0x3d9   : > { %v627_v60 = vmul.f32 1.442695, %v626_v59 }
 0x3db   : > { %3131 = vpow2.f32 %v627_v60  ;;  %v790_v61 = vpop.xlane.xlu1 %789 }
 0x3dc   : > { %v791_v62 = vsub.f32 %v785_v48, %v790_v61 }
 0x3de   : > { %v792_v63 = vmul.f32 1.442695, %v791_v62 }
 0x3df   : > { %v470_v0 = vpop.permute.xlu1 %469 }
 0x3e0   : > { %3133 = vpow2.f32 %v792_v63  ;;  %2898 = vmatpush3.msra.mxu1 %v470_v0  ;;  %v295_v63 = vld [vmem:[%s3857_s2 + $0x38] sm:$0xff]  ;;  %v293_v0 = vld [vmem:[%s3857_s2 + $0x28] sm:$0xff] }
 0x3e1   : > { %2907 = vmatprep.subr.mxu1 %v3238_v8 }
 0x3e3   : > { %v955_v1 = vpop.xlane.xlu0 %954 }
 0x3e4   : > { %v3130_v2 = vpop.eup %3129  ;;  %v956_v3 = vsub.f32 %v950_v52, %v955_v1  ;;  %v1060_v52 = vrot.slane %v3405_v26, %v3392_v19  ;;  %v289_v1 = vld [vmem:[%s3857_s2 + $0x8] sm:$0xff] }
 0x3e5   : > { %v464_v4 = vsel %vm383_vm2, %v3130_v2, 0.0 }
 0x3e6   : > { %v957_v5 = vmul.f32 1.442695, %v956_v3  ;;  %465 = vadd.xlane.f32.xlu1 %v464_v4 }
 0x3e8   : > { %v3132_v6 = vpop.eup %3131  ;;  %3135 = vpow2.f32 %v957_v5  ;;  %v1166_v5 = vsub.s32 4, %v3383_v16 }
 0x3e9   : > { %v629_v12 = vsel %vm383_vm2, %v3132_v6, 0.0 }
 0x3ea   : > { %630 = vadd.xlane.f32.xlu0 %v629_v12  ;;  %v1167_v12 = vrot.slane %v3405_v26, %v1166_v5 }
 0x3ed   : > { %v3134_v13 = vpop.eup %3133 }
 0x3ee   : > { %v794_v14 = vsel %vm383_vm2, %v3134_v13, 0.0 }
 0x3ef   : > { %795 = vadd.xlane.f32.xlu1 %v794_v14 }
 0x3f5   : > { %v3136_v15 = vpop.eup %3135 }
 0x3f6   : > { %v959_v18 = vsel %vm383_vm2, %v3136_v15, 0.0 }
 0x3f7   : > { %960 = vadd.xlane.f32.xlu0 %v959_v18 }
 0x400   : > { %799 = vrot.lane.b32.xlu1 %v3409_v29, %s3248_s28 }
 0x404   : > { %964 = vrot.lane.b32.xlu1 %v3409_v29, %s3868_s29 }
 0x408   : > { %1069 = vrot.lane.b32.xlu1 %v3358_v9, %s3866_s11 }
 0x40c   : > { %1067 = vrot.lane.b32.xlu1 %v3368_v10, %s3866_s11 }
 0x40d   : > { %634 = vrot.lane.b32.xlu0 %v3409_v29, %s3865_s10 }
 0x411   : > { %1071 = vrot.lane.b32.xlu0 %v3352_v7, %s3866_s11 }
 0x46f   : > { %v466_v20 = vpop.xlane.xlu1 %465 }
 0x470   : > { %3137 = vrcp.f32 %v466_v20 }
 0x473   : > { %v631_v21 = vpop.xlane.xlu0 %630 }
 0x474   : > { %3139 = vrcp.f32 %v631_v21 }
 0x478   : > { %v796_v22 = vpop.xlane.xlu1 %795 }
 0x479   : > { %3141 = vrcp.f32 %v796_v22 }
 0x47c   : > { %v800_v30 = vpop.permute.xlu1 %799 }
 0x47d   : > { %v3138_v23 = vpop.eup %3137 }
 0x47e   : > { %v468_v24 = vmul.f32 %v3138_v23, %v3130_v2 }
 0x480   : > { %2900 = vmatmul.mubr.msk.f32.vlgmr.msra.gmra.mxu1 %vm383_vm2, %v468_v24  ;;  %v961_v27 = vpop.xlane.xlu0 %960  ;;  %v965_v34 = vpop.permute.xlu1 %964 }
 0x481   : > { %v3140_v28 = vpop.eup %3139  ;;  %3143 = vrcp.f32 %v961_v27  ;;  %2909 = vmatprep.mubr.msk.f32.mxu1 %vm3239_vm1, %v3238_v8  ;;  %v1176_v27 = vsub.s32 2, %v3383_v16 }
 0x482   : > { %v633_v32 = vmul.f32 %v3140_v28, %v3132_v6  ;;  %v1171_v6 = vsub.s32 5, %v3383_v16 }
 0x483   : > { %v1177_v28 = vrot.slane %v3405_v26, %v1176_v27 }
 0x484   : > { %v635_v31 = vpop.permute.xlu0 %634  ;;  %v1070_v39 = vpop.permute.xlu1 %1069 }
 0x485   : > { %2908 = vmatpush3.msra.mxu1 %v635_v31 }
 0x486   : > { %v3142_v29 = vpop.eup %3141  ;;  %2910 = vmatmul.mubr.msk.f32.vlgmr.msra.gmra.mxu1 %vm383_vm2, %v633_v32  ;;  %2917 = vmatprep.subr.mxu1 %v3238_v8 }
 0x487   : > { %2918 = vmatpush3.msra.mxu1 %v800_v30  ;;  %2919 = vmatprep.mubr.msk.f32.mxu1 %vm3239_vm1, %v3238_v8  ;;  %v798_v33 = vmul.f32 %v3142_v29, %v3134_v13 }
 0x488   : > { %2927 = vmatprep.subr.mxu1 %v3238_v8  ;;  %v1072_v37 = vpop.permute.xlu0 %1071  ;;  %v1068_v40 = vpop.permute.xlu1 %1067 }
 0x489   : > { %2933 = vmatpush3.msra.mxu0 %v1072_v37 }
 0x48a   : > { %2920 = vmatmul.mubr.msk.f32.vlgmr.msra.gmra.mxu1 %vm383_vm2, %v798_v33  ;;  %2934 = vmatprep.subr.mxu0 %v3238_v8 }
 0x48b   : > { %2928 = vmatpush3.msra.mxu1 %v965_v34  ;;  %2929 = vmatprep.mubr.msk.f32.mxu1 %vm3239_vm1, %v3238_v8 }
 0x48c   : > { %2943 = vmatprep.subr.mxu1 %v3238_v8  ;;  %2935 = vmatpush3.msra.mxu0 %v1070_v39 }
 0x48d   : > { %2936 = vmatprep.subr.mxu0 %v3238_v8 }
 0x48e   : > { %v3144_v35 = vpop.eup %3143  ;;  %2937 = vmatpush3.msra.mxu0 %v1068_v40 }
 0x48f   : > { %v963_v36 = vmul.f32 %v3144_v35, %v3136_v15  ;;  %2938 = vmatprep.subr.mxu0 %v3238_v8  ;;  %v1172_v15 = vrot.slane %v3405_v26, %v1171_v6 }
 0x491   : > { %2930 = vmatmul.mubr.msk.f32.vlgmr.msra.gmra.mxu1 %vm383_vm2, %v963_v36 }
 0x492   : > { %2951 = vmatprep.mubr.msk.f32.mxu1 %vm3239_vm1, %v3238_v8  ;;  %2944 = vmatpush3.msra.mxu1 %v295_v63 }
 0x493   : > { %2945 = vmatprep.subr.mxu1 %v3238_v8 }
 0x494   : > { %2946 = vmatpush3.msra.mxu1 %v293_v0 }
 0x495   : > { %2947 = vmatprep.subr.mxu1 %v3238_v8 }
 0x540   : > { %v541_v41 = vpop.f32.mrf.mxu1 }
 0x542   : > { %v2901_v7 = vpop.f32.mrf.mxu1 }
 0x543   : > { %v1262_v7 = vsub.s32 3, %v3383_v16 }
 0x546   : > { %v706_v42 = vpop.f32.mrf.mxu1 }
 0x547   : > { %1041 = vrot.lane.b32.xlu0 %v706_v42, %s3864_s19  ;;  %v1263_v42 = vrot.slane %v3405_v26, %v1262_v7  ;;  %s3255_s19 = smov [#allocation2]  }
 0x548   : > { %v2911_v9 = vpop.f32.mrf.mxu1 }
 0x54a   : > { %v871_v10 = vpop.f32.mrf.mxu1 }
 0x54b   : > { %1045 = vrot.lane.b32.xlu0 %v871_v10, %s3863_s20 }
 0x54c   : > { %v2921_v43 = vpop.f32.mrf.mxu1 }
 0x54f   : > { %1065 = vrot.lane.b32.xlu0 %v3377_v11, %s3866_s11 }
 0x551   : > { %v1036_v44 = vpop.f32.mrf.mxu1 }
 0x552   : > { %1049 = vrot.lane.b32.xlu1 %v1036_v44, %s3862_s26 }
 0x553   : > { %v2931_v45 = vpop.f32.mrf.mxu1 }
 0x5b9   : > { %v1042_v46 = vpop.permute.xlu0 %1041 }
 0x5ba   : > { %v1052_v49 = vsel %vm383_vm2, %v541_v41, %v1042_v46 }
 0x5bd   : > { %v1046_v47 = vpop.permute.xlu0 %1045 }
 0x5be   : > { %v1054_v50 = vsel %vm1053_vm3, %v1052_v49, %v1046_v47 }
 0x5c1   : > { %v1066_v48 = vpop.permute.xlu0 %1065 }
 0x5c2   : > { %2939 = vmatpush3.msra.mxu0 %v1066_v48 }
 0x5c3   : > { %2954 = vmatprep.subr.mxu0 %v3238_v8 }
 0x5c4   : > { %v1050_v51 = vpop.permute.xlu1 %1049 }
 0x5c5   : > { %v1056_v11 = vsel %vm1055_vm4, %v1054_v50, %v1050_v51  ;;  %v3569_v51 = vld [vmem:[%s3857_s2 + $0x70] sm:$0xff] }
 0x5c6   : > { %2941 = vmatmul.mubr.msk.f32.vlgmr.msra.gmra.mxu0 %vm262_vm0, %v1056_v11  ;;  %v3575_v11 = vld [vmem:[%s3857_s2 + $0x60] sm:$0xff] }
 0x5c7   : > { %2962 = vmatprep.mubr.msk.f32.mxu0 %vm3239_vm1, %v3238_v8 }
 0x686   : > { %v1146_v53 = vpop.f32.mrf.mxu0 }
 0x687   : > { %v1147_v54 = vadd.f32 %v1146_v53, %v1060_v52  ;;  %v3581_v52 = vld [vmem:[%s3857_s2 + $0x50] sm:$0xff]  ;;  %v3588_v53 = vld [vmem:[%s3857_s2 + $0x40] sm:$0xff] }
 0x688   : > { %v2942_v55 = vpop.f32.mrf.mxu0 }
 0x689   : > { %v1150_v56 = vadd.f32 %v1147_v54, %v3396_v25  ;;  %v291_v25 = vld [vmem:[%s3857_s2 + $0x18] sm:$0xff] }
 0x68a   : > { %2948 = vmatpush3.msra.mxu1 %v291_v25 }
 0x68b   : > { %v1151_v57 = vsel %vm262_vm0, %v1150_v56, 0.0  ;;  %2949 = vmatprep.subr.mxu1 %v3238_v8 }
 0x68c   : > { %1152 = vadd.xlane.f32.xlu1 %v1151_v57  ;;  %2950 = vmatpush3.msra.mxu1 %v289_v1  ;;  %v1374_v57 = vsub.s32 6, %v3383_v16 }
 0x68d   : > { %2965 = vmatprep.subr.mxu1 %v3238_v8 }
 0x69d   : > { %1272 = vrot.lane.b32.xlu1 %v293_v0, %s3247_s9 }
 0x6a1   : > { %1270 = vrot.lane.b32.xlu1 %v291_v25, %s3247_s9  ;;  %v3611_v25 = vld [vmem:[%s3858_s3 + $0x8] sm:$0xff] }
 0x715   : > { %v1153_v58 = vpop.xlane.xlu1 %1152 }
 0x716   : > { %v1154_v59 = vmul.f32 0.03125, %v1153_v58  ;;  %v1379_v58 = vsub.s32 7, %v3383_v16 }
 0x718   : > { %v1155_v60 = vsub.f32 %v1150_v56, %v1154_v59  ;;  %v1375_v59 = vrot.slane %v3405_v26, %v1374_v57 }
 0x719   : > { %v1273_v22 = vpop.permute.xlu1 %1272 }
 0x71a   : > { %v1156_v61 = vmul.f32 %v1155_v60, %v1155_v60 }
 0x71c   : > { %v1157_v62 = vsel %vm262_vm0, %v1156_v61, 0.0 }
 0x71d   : > { %1158 = vadd.xlane.f32.xlu0 %v1157_v62  ;;  %v1271_v23 = vpop.permute.xlu1 %1270  ;;  %v1380_v62 = vrot.slane %v3405_v26, %v1379_v58 }
 0x733   : > { %1274 = vrot.lane.b32.xlu0 %v295_v63, %s3247_s9 }
 0x737   : > { %1268 = vrot.lane.b32.xlu0 %v289_v1, %s3247_s9  ;;  %v1396_v1 = vrot.slane %v3611_v25, %v3386_v17 }
 0x7a6   : > { %v1159_v2 = vpop.xlane.xlu0 %1158 }
 0x7a7   : > { %v1160_v3 = vmul.f32 0.03125, %v1159_v2 }
 0x7a9   : > { %v1161_v4 = vadd.f32 1e-12, %v1160_v3 }
 0x7aa   : > { %v1275_v21 = vpop.permute.xlu0 %1274 }
 0x7ab   : > { %3145 = vrsqrt.f32 %v1161_v4  ;;  %2955 = vmatpush3.xpose.msk.msra.mxu0 %vm1276_vm5, %v1275_v21 }
 0x7ac   : > { %2956 = vmatprep.subr.mxu0 %v3238_v8 }
 0x7ae   : > { %v1269_v24 = vpop.permute.xlu0 %1268 }
 0x7af   : > { %2957 = vmatpush3.xpose.msk.msra.mxu0 %vm1276_vm5, %v1273_v22 }
 0x7b0   : > { %2958 = vmatprep.subr.mxu0 %v3238_v8 }
 0x7b3   : > { %2959 = vmatpush3.xpose.msk.msra.mxu0 %vm1276_vm5, %v1271_v23 }
 0x7b4   : > { %2960 = vmatprep.subr.mxu0 %v3238_v8 }
 0x7b7   : > { %2961 = vmatpush3.xpose.msk.msra.mxu0 %vm1276_vm5, %v1269_v24 }
 0x7b8   : > { %v3146_v13 = vpop.eup %3145  ;;  %2986 = vmatprep.subr.mxu0 %v3238_v8 }
 0x7b9   : > { %v1163_v14 = vmul.f32 %v3146_v13, %v1155_v60 }
 0x7bb   : > { %v1168_v18 = vmul.f32 %v1167_v12, %v1163_v14 }
 0x7bd   : > { %v1173_v20 = vadd.f32 %v1172_v15, %v1168_v18 }
 0x7bf   : > { %2952 = vmatmul.mubr.msk.f32.vlgmr.msra.gmra.mxu1 %vm262_vm0, %v1173_v20 }
 0x7c0   : > { %2973 = vmatprep.mubr.msk.f32.mxu1 %vm3239_vm1, %v3238_v8  ;;  %2966 = vmatpush3.msra.mxu1 %v3569_v51 }
 0x7c1   : > { %2967 = vmatprep.subr.mxu1 %v3238_v8 }
 0x7c2   : > { %2968 = vmatpush3.msra.mxu1 %v3575_v11 }
 0x7c3   : > { %2969 = vmatprep.subr.mxu1 %v3238_v8 }
 0x7c4   : > { %2970 = vmatpush3.msra.mxu1 %v3581_v52 }
 0x7c5   : > { %2971 = vmatprep.subr.mxu1 %v3238_v8 }
 0x7c6   : > { %2972 = vmatpush3.msra.mxu1 %v3588_v53 }
 0x7c7   : > { %2976 = vmatprep.subr.mxu1 %v3238_v8 }
 0x87f   : > { %v1247_v30 = vpop.f32.mrf.mxu1 }
 0x880   : > { %v1248_v31 = vadd.f32 %v1247_v30, %v1177_v28 }
 0x881   : > { %v2953_v32 = vpop.f32.mrf.mxu1 }
 0x882   : > { %v1251_v29 = vmul.f32 %v1248_v31, %v1248_v31 }
 0x884   : > { %v1252_v33 = vmul.f32 %v1251_v29, %v1248_v31 }
 0x886   : > { %v1253_v34 = vmul.f32 0.044715, %v1252_v33 }
 0x888   : > { %v1254_v35 = vadd.f32 %v1253_v34, %v1248_v31 }
 0x88a   : > { %v1255_v36 = vmul.f32 0.7978846, %v1254_v35 }
 0x88c   : > { %3147 = vtanh.f32 %v1255_v36 }
 0x899   : > { %v3148_v37 = vpop.eup %3147 }
 0x89a   : > { %v1257_v39 = vadd.f32 1.0, %v3148_v37 }
 0x89c   : > { %v1258_v40 = vmul.f32 0.5, %v1257_v39 }
 0x89e   : > { %v1259_v41 = vmul.f32 %v1258_v40, %v1248_v31 }
 0x8a0   : > { %2963 = vmatmul.mubr.msk.f32.vlgmr.msra.gmra.mxu0 %vm1276_vm5, %v1259_v41 }
 0x8a1   : > { %2988 = vmatprep.mubr.msk.f32.mxu0 %vm3239_vm1, %v3238_v8 }
 0x960   : > { %v1354_v9 = vpop.f32.mrf.mxu0 }
 0x961   : > { %v1355_v10 = vadd.f32 %v1354_v9, %v1263_v42 }
 0x962   : > { %v2964_v43 = vpop.f32.mrf.mxu0 }
 0x963   : > { %v1358_v44 = vadd.f32 %v1355_v10, %v1173_v20 }
 0x965   : > { %v1359_v45 = vsel %vm262_vm0, %v1358_v44, 0.0 }
 0x966   : > { %1360 = vadd.xlane.f32.xlu1 %v1359_v45 }
 0x9ef   : > { %v1361_v46 = vpop.xlane.xlu1 %1360 }
 0x9f0   : > { %v1362_v47 = vmul.f32 0.03125, %v1361_v46 }
 0x9f2   : > { %v1363_v48 = vsub.f32 %v1358_v44, %v1362_v47 }
 0x9f4   : > { %v1364_v49 = vmul.f32 %v1363_v48, %v1363_v48 }
 0x9f6   : > { %v1365_v50 = vsel %vm262_vm0, %v1364_v49, 0.0 }
 0x9f7   : > { %1366 = vadd.xlane.f32.xlu0 %v1365_v50 }
 0xa80   : > { %v1367_v54 = vpop.xlane.xlu0 %1366 }
 0xa81   : > { %v1368_v55 = vmul.f32 0.03125, %v1367_v54 }
 0xa83   : > { %v1369_v56 = vadd.f32 1e-12, %v1368_v55 }
 0xa85   : > { %3149 = vrsqrt.f32 %v1369_v56 }
 0xa92   : > { %v3150_v60 = vpop.eup %3149 }
 0xa93   : > { %v1371_v61 = vmul.f32 %v3150_v60, %v1363_v48 }
 0xa95   : > { %v1376_v63 = vmul.f32 %v1375_v59, %v1371_v61 }
 0xa97   : > { %v3602_v0 = vadd.f32 %v1380_v62, %v1376_v63 }
 0xa99   : > { %2974 = vmatmul.mubr.msk.f32.vlgmr.msra.gmra.mxu1 %vm262_vm0, %v3602_v0 }
 0xa9a   : > { %2978 = vmatprep.mubr.msk.f32.mxu1 %vm3239_vm1, %v3238_v8 }
 0xb59   : > { %v1466_v2 = vpop.f32.mrf.mxu1 }
 0xb5a   : > { %v3615_v3 = vadd.f32 %v1466_v2, %v1396_v1 }
 0xb5b   : > { %v2975_v26 = vpop.f32.mrf.mxu1 }
 0xb5c   : > { %1636 = vrot.lane.b32.xlu1 %v3615_v3, %s3242_s14  ;;  %1471 = vrot.lane.b32.xlu0 %v3615_v3, %s3241_s13  ;;  %s3872_s14 = smov 32  }
 0xb60   : > { %1634 = vrot.lane.b32.xlu1 %v3615_v3, %s3240_s12  ;;  %1801 = vrot.lane.b32.xlu0 %v3615_v3, %s3243_s15  ;;  %s3871_s12 = smov 40   ;;  %s3873_s15 = smov 56  }
 0xb64   : > { %1799 = vrot.lane.b32.xlu1 %v3615_v3, %s3244_s16  ;;  %1966 = vrot.lane.b32.xlu0 %v3615_v3, %s3245_s17  ;;  %s3874_s16 = smov 8   ;;  %s3875_s17 = smov 16  }
 0xb68   : > { %1964 = vrot.lane.b32.xlu1 %v3615_v3, %s3246_s18  ;;  %s3876_s18 = smov 24  }
 0xbce   : > { %v1637_v17 = vpop.permute.xlu1 %1636  ;;  %v1472_v4 = vpop.permute.xlu0 %1471 }
 0xbcf   : > { %2977 = vmatpush3.xpose.msk.msra.mxu1 %vm383_vm2, %v1472_v4  ;;  %2987 = vmatpush3.xpose.msk.msra.mxu0 %vm383_vm2, %v1637_v17 }
 0xbd0   : > { %2996 = vmatprep.subr.mxu0 %v3238_v8  ;;  %2981 = vmatprep.subr.mxu1 %v3238_v8 }
 0xbd2   : > { %v1635_v12 = vpop.permute.xlu1 %1634  ;;  %2979 = vmatmul.mubr.msk.f32.vlgmr.msra.gmra.mxu1 %vm383_vm2, %v3615_v3  ;;  %v1802_v13 = vpop.permute.xlu0 %1801 }
 0xbd3   : > { %2989 = vmatmul.mubr.msk.f32.vlgmr.msra.gmra.mxu0 %vm383_vm2, %v1635_v12  ;;  %2983 = vmatprep.mubr.msk.f32.mxu1 %vm3239_vm1, %v3238_v8 }
 0xbd4   : > { %2997 = vmatpush3.xpose.msk.msra.mxu0 %vm383_vm2, %v1802_v13  ;;  %2998 = vmatprep.mubr.msk.f32.mxu0 %vm3239_vm1, %v3238_v8 }
 0xbd5   : > { %3006 = vmatprep.subr.mxu0 %v3238_v8 }
 0xbd6   : > { %v1800_v14 = vpop.permute.xlu1 %1799  ;;  %v1967_v15 = vpop.permute.xlu0 %1966 }
 0xbd7   : > { %2999 = vmatmul.mubr.msk.f32.vlgmr.msra.gmra.mxu0 %vm383_vm2, %v1800_v14 }
 0xbd8   : > { %3007 = vmatpush3.xpose.msk.msra.mxu0 %vm383_vm2, %v1967_v15  ;;  %3008 = vmatprep.mubr.msk.f32.mxu0 %vm3239_vm1, %v3238_v8 }
 0xbd9   : > { %3016 = vmatprep.subr.mxu0 %v3238_v8 }
 0xbda   : > { %v1965_v18 = vpop.permute.xlu1 %1964 }
 0xbdb   : > { %3009 = vmatmul.mubr.msk.f32.vlgmr.msra.gmra.mxu0 %vm383_vm2, %v1965_v18 }
 0xbdc   : > { %3024 = vmatprep.mubr.msk.f32.mxu0 %vm3239_vm1, %v3238_v8 }
 0xc92   : > { %v1543_v20 = vpop.f32.mrf.mxu1 }
 0xc93   : > { %v1544_v21 = vadd.f32 %v3450_v38, %v1543_v20  ;;  %v1708_v22 = vpop.f32.mrf.mxu0 }
 0xc94   : > { %v1709_v23 = vadd.f32 %v3450_v38, %v1708_v22  ;;  %v2980_v24 = vpop.f32.mrf.mxu1 }
 0xc95   : > { %v2990_v28 = vpop.f32.mrf.mxu0  ;;  %v1547_v30 = vsel %vm383_vm2, %v1544_v21, -inf }
 0xc96   : > { %1548 = vmax.xlane.f32.xlu0 %v1547_v30  ;;  %v1712_v31 = vsel %vm383_vm2, %v1709_v23, -inf }
 0xc97   : > { %1713 = vmax.xlane.f32.xlu1 %v1712_v31  ;;  %v1873_v32 = vpop.f32.mrf.mxu0 }
 0xc98   : > { %v1874_v29 = vadd.f32 %v3450_v38, %v1873_v32 }
 0xc99   : > { %v3000_v33 = vpop.f32.mrf.mxu0 }
 0xc9a   : > { %v1877_v34 = vsel %vm383_vm2, %v1874_v29, -inf }
 0xc9b   : > { %1878 = vmax.xlane.f32.xlu0 %v1877_v34  ;;  %v2038_v35 = vpop.f32.mrf.mxu0 }
 0xc9c   : > { %v2039_v36 = vadd.f32 %v3450_v38, %v2038_v35 }
 0xc9d   : > { %v3010_v37 = vpop.f32.mrf.mxu0 }
 0xc9e   : > { %v2042_v39 = vsel %vm383_vm2, %v2039_v36, -inf }
 0xc9f   : > { %2043 = vmax.xlane.f32.xlu0 %v2042_v39 }
 0xca8   : > { %1558 = vrot.lane.b32.xlu1 %v3615_v3, %s3247_s9 }
 0xd1f   : > { %v1549_v40 = vpop.xlane.xlu0 %1548 }
 0xd20   : > { %v1550_v41 = vsub.f32 %v1544_v21, %v1549_v40  ;;  %v1714_v42 = vpop.xlane.xlu1 %1713 }
 0xd21   : > { %v1715_v9 = vsub.f32 %v1709_v23, %v1714_v42 }
 0xd22   : > { %v1551_v10 = vmul.f32 1.442695, %v1550_v41 }
 0xd23   : > { %v1716_v43 = vmul.f32 1.442695, %v1715_v9 }
 0xd24   : > { %3151 = vpow2.f32 %v1551_v10  ;;  %v1559_v44 = vpop.permute.xlu1 %1558  ;;  %v1879_v45 = vpop.xlane.xlu0 %1878 }
 0xd25   : > { %3153 = vpow2.f32 %v1716_v43  ;;  %v1880_v46 = vsub.f32 %v1874_v29, %v1879_v45  ;;  %2982 = vmatpush3.msra.mxu1 %v1559_v44 }
 0xd26   : > { %2991 = vmatprep.subr.mxu1 %v3238_v8 }
 0xd27   : > { %v1881_v38 = vmul.f32 1.442695, %v1880_v46 }
 0xd28   : > { %v2044_v47 = vpop.xlane.xlu0 %2043 }
 0xd29   : > { %3155 = vpow2.f32 %v1881_v38  ;;  %v2045_v48 = vsub.f32 %v2039_v36, %v2044_v47 }
 0xd2b   : > { %v2046_v49 = vmul.f32 1.442695, %v2045_v48 }
 0xd2d   : > { %3157 = vpow2.f32 %v2046_v49  ;;  %v2772_v49 = vld [vmem:[%s3857_s2 + $0x78] sm:$0xff] }
 0xd31   : > { %v3152_v50 = vpop.eup %3151 }
 0xd32   : > { %v3154_v54 = vpop.eup %3153  ;;  %v1553_v55 = vsel %vm383_vm2, %v3152_v50, 0.0 }
 0xd33   : > { %1554 = vadd.xlane.f32.xlu1 %v1553_v55  ;;  %v1718_v56 = vsel %vm383_vm2, %v3154_v54, 0.0 }
 0xd34   : > { %1719 = vadd.xlane.f32.xlu0 %v1718_v56 }
 0xd36   : > { %v3156_v59 = vpop.eup %3155 }
 0xd37   : > { %v1883_v60 = vsel %vm383_vm2, %v3156_v59, 0.0 }
 0xd38   : > { %1884 = vadd.xlane.f32.xlu1 %v1883_v60 }
 0xd3a   : > { %v3158_v61 = vpop.eup %3157 }
 0xd3b   : > { %v2048_v62 = vsel %vm383_vm2, %v3158_v61, 0.0 }
 0xd3c   : > { %2049 = vadd.xlane.f32.xlu0 %v2048_v62  ;;  %v2259_v62 = vrot.slane %v3611_v25, %v1171_v6 }
 0xd49   : > { %1888 = vrot.lane.b32.xlu1 %v3615_v3, %s3248_s28 }
 0xd4d   : > { %2053 = vrot.lane.b32.xlu1 %v3615_v3, %s3871_s12 }
 0xd51   : > { %2156 = vrot.lane.b32.xlu1 %v3575_v11, %s3872_s14 }
 0xd52   : > { %1723 = vrot.lane.b32.xlu0 %v3615_v3, %s3873_s15 }
 0xd55   : > { %2154 = vrot.lane.b32.xlu1 %v3581_v52, %s3872_s14 }
 0xd56   : > { %2158 = vrot.lane.b32.xlu0 %v3569_v51, %s3872_s14 }
 0xdbc   : > { %v1555_v63 = vpop.xlane.xlu1 %1554 }
 0xdbd   : > { %3159 = vrcp.f32 %v1555_v63  ;;  %v1720_v1 = vpop.xlane.xlu0 %1719 }
 0xdbe   : > { %3161 = vrcp.f32 %v1720_v1 }
 0xdc1   : > { %v1885_v2 = vpop.xlane.xlu1 %1884 }
 0xdc2   : > { %3163 = vrcp.f32 %v1885_v2 }
 0xdc5   : > { %v2050_v26 = vpop.xlane.xlu0 %2049  ;;  %v1889_v52 = vpop.permute.xlu1 %1888 }
 0xdc6   : > { %3165 = vrcp.f32 %v2050_v26 }
 0xdc9   : > { %v1724_v12 = vpop.permute.xlu0 %1723  ;;  %v2054_v15 = vpop.permute.xlu1 %2053 }
 0xdca   : > { %v3160_v17 = vpop.eup %3159 }
 0xdcb   : > { %v1557_v4 = vmul.f32 %v3160_v17, %v3152_v50  ;;  %v3162_v11 = vpop.eup %3161  ;;  %v2766_v50 = vld [vmem:[%s3857_s2 + $0x48] sm:$0xff]  ;;  %v2264_v17 = vrot.slane %v3611_v25, %v1176_v27 }
 0xdcc   : > { %v1722_v51 = vmul.f32 %v3162_v11, %v3154_v54 }
 0xdcd   : > { %2984 = vmatmul.mubr.msk.f32.vlgmr.msra.gmra.mxu1 %vm383_vm2, %v1557_v4  ;;  %v2159_v20 = vpop.permute.xlu0 %2158  ;;  %v2157_v21 = vpop.permute.xlu1 %2156 }
 0xdce   : > { %2992 = vmatpush3.msra.mxu1 %v1724_v12  ;;  %2993 = vmatprep.mubr.msk.f32.mxu1 %vm3239_vm1, %v3238_v8 }
 0xdcf   : > { %3001 = vmatprep.subr.mxu1 %v3238_v8  ;;  %v3164_v3 = vpop.eup %3163  ;;  %3017 = vmatpush3.msra.mxu0 %v2159_v20 }
 0xdd0   : > { %v1887_v13 = vmul.f32 %v3164_v3, %v3156_v59  ;;  %3018 = vmatprep.subr.mxu0 %v3238_v8  ;;  %v2254_v59 = vrot.slane %v3611_v25, %v1166_v5 }
 0xdd1   : > { %2994 = vmatmul.mubr.msk.f32.vlgmr.msra.gmra.mxu1 %vm383_vm2, %v1722_v51  ;;  %3019 = vmatpush3.msra.mxu0 %v2157_v21  ;;  %v2155_v22 = vpop.permute.xlu1 %2154 }
 0xdd2   : > { %3002 = vmatpush3.msra.mxu1 %v1889_v52  ;;  %3003 = vmatprep.mubr.msk.f32.mxu1 %vm3239_vm1, %v3238_v8 }
 0xdd3   : > { %3011 = vmatprep.subr.mxu1 %v3238_v8  ;;  %v3166_v14 = vpop.eup %3165  ;;  %3020 = vmatprep.subr.mxu0 %v3238_v8 }
 0xdd4   : > { %v2052_v18 = vmul.f32 %v3166_v14, %v3158_v61  ;;  %3021 = vmatpush3.msra.mxu0 %v2155_v22  ;;  %v2350_v22 = vrot.slane %v3611_v25, %v1262_v7  ;;  %v2472_v7 = vld [vmem:[%s3859_s4 + $0x20] sm:$0xff] }
 0xdd5   : > { %3004 = vmatmul.mubr.msk.f32.vlgmr.msra.gmra.mxu1 %vm383_vm2, %v1887_v13  ;;  %3022 = vmatprep.subr.mxu0 %v3238_v8 }
 0xdd6   : > { %3012 = vmatpush3.msra.mxu1 %v2054_v15  ;;  %3013 = vmatprep.mubr.msk.f32.mxu1 %vm3239_vm1, %v3238_v8 }
 0xdd7   : > { %3027 = vmatprep.subr.mxu1 %v3238_v8 }
 0xdd9   : > { %3014 = vmatmul.mubr.msk.f32.vlgmr.msra.gmra.mxu1 %vm383_vm2, %v2052_v18 }
 0xdda   : > { %3035 = vmatprep.mubr.msk.f32.mxu1 %vm3239_vm1, %v3238_v8  ;;  %3028 = vmatpush3.msra.mxu1 %v2772_v49 }
 0xddb   : > { %3029 = vmatprep.subr.mxu1 %v3238_v8 }
 0xe8d   : > { %v1630_v23 = vpop.f32.mrf.mxu1 }
 0xe8f   : > { %v2985_v24 = vpop.f32.mrf.mxu1 }
 0xe91   : > { %v1795_v28 = vpop.f32.mrf.mxu1 }
 0xe92   : > { %2130 = vrot.lane.b32.xlu0 %v1795_v28, %s3874_s16  ;;  %s251_s16 = sand.u32 1, %s3228_s22  }
 0xe93   : > { %v2995_v30 = vpop.f32.mrf.mxu1  ;;  %s2663_s10 = scalar_lea.sflag [#allocation3], %s251_s16 }
 0xe95   : > { %v1960_v31 = vpop.f32.mrf.mxu1 }
 0xe96   : > { %2134 = vrot.lane.b32.xlu0 %v1960_v31, %s3875_s17  ;;  %s2796_s17 = sshll.u32 %s3312_s25, 4  ;;  %s3180_s25 = sshll.u32 %s3255_s19, 4  ;;  %s3181_s25 = int_to_ptr.vmem [resolvable:$false] %s3180_s25 }
 0xe97   : > { %v3005_v32 = vpop.f32.mrf.mxu1  ;;  %s3820_s29 = scalar_lea.hbm %s3861_s6, %s2796_s17  ;;  %s3182_s12 = scalar_lea.vmem %s3181_s25, 32 }
 0xe99   : > { %v2125_v29 = vpop.f32.mrf.mxu1 }
 0xe9a   : > { %2152 = vrot.lane.b32.xlu0 %v3588_v53, %s3872_s14  ;;  %2138 = vrot.lane.b32.xlu1 %v2125_v29, %s3876_s18  ;;  %v2147_v53 = vrot.slane %v3611_v25, %v3392_v19  ;;  %v2770_v19 = vld [vmem:[%s3857_s2 + $0x68] sm:$0xff]  ;;  %s252_s18 = scalar_lea.vmem [#allocation2], %s251_s16 }
 0xe9b   : > { %v3015_v33 = vpop.f32.mrf.mxu1  ;;  %3030 = vmatpush3.msra.mxu1 %v2770_v19  ;;  %s2675_s28 = sshll.u32 %s252_s18, 4  ;;  %s2676_s28 = int_to_ptr.vmem [resolvable:$true] %s2675_s28 }
 0xe9c   : > { %3031 = vmatprep.subr.mxu1 %v3238_v8  ;;  %s3176_s11 = scalar_lea.vmem %s2676_s28, 16  ;;  %p3183_p0 = scmp.lt.s32.totalorder %s2676_s28, %s3181_s25 }
 0xe9d   : > { %p3177_p11 = scmp.ne.s32.totalorder %s2676_s28, %s3176_s11  ;;  %p3184_p1 = scmp.lt.s32.totalorder %s3182_s12, %s3176_s11 }
 0xe9f   : > { %p3178_p12 = pnand %p3177_p11, %p3329_p5  ;;  %p3185_p2 = por %p3184_p1, %p3183_p0 }
 0xea1   : > { %p3179_p13 = pneg %p3178_p12 }
 0xea3   : > { %p3186_p3 = pnand %p3185_p2, %p3179_p13 }
 0xf04   : > { %v2131_v34 = vpop.permute.xlu0 %2130 }
 0xf05   : > { %v2141_v36 = vsel %vm383_vm2, %v1630_v23, %v2131_v34 }
 0xf08   : > { %v2135_v35 = vpop.permute.xlu0 %2134 }
 0xf09   : > { %v2142_v37 = vsel %vm1053_vm3, %v2141_v36, %v2135_v35  ;;  %v2474_v35 = vld [vmem:[%s3859_s4 + $0x30] sm:$0xff] }
 0xf0a   : > { %v2470_v36 = vld [vmem:[%s3859_s4 + $0x10] sm:$0xff] }
 0xf0c   : > { %v2139_v39 = vpop.permute.xlu1 %2138  ;;  %v2153_v40 = vpop.permute.xlu0 %2152 }
 0xf0d   : > { %v2143_v41 = vsel %vm1055_vm4, %v2142_v37, %v2139_v39  ;;  %3023 = vmatpush3.msra.mxu0 %v2153_v40  ;;  %v2468_v37 = vld [vmem:[%s3859_s4] sm:$0xff]  ;;  %v2475_v39 = vld [vmem:[%s3859_s4 + $0x38] sm:$0xff]  ;;  %v2473_v40 = vld [vmem:[%s3859_s4 + $0x28] sm:$0xff] }
 0xf0e   : > { %3025 = vmatmul.mubr.msk.f32.vlgmr.msra.gmra.mxu0 %vm262_vm0, %v2143_v41  ;;  %3038 = vmatprep.subr.mxu0 %v3238_v8  ;;  %v2471_v41 = vld [vmem:[%s3859_s4 + $0x18] sm:$0xff] }
 0xf0f   : > { %3046 = vmatprep.mubr.msk.f32.mxu0 %vm3239_vm1, %v3238_v8 }
 0xfce   : > { %v2233_v42 = vpop.f32.mrf.mxu0 }
 0xfcf   : > { %v2234_v9 = vadd.f32 %v2233_v42, %v2147_v53  ;;  %v2469_v53 = vld [vmem:[%s3859_s4 + $0x8] sm:$0xff] }
 0xfd0   : > { %v3026_v10 = vpop.f32.mrf.mxu0 }
 0xfd1   : > { %v2237_v43 = vadd.f32 %v2234_v9, %v3602_v0  ;;  %v2768_v0 = vld [vmem:[%s3857_s2 + $0x58] sm:$0xff] }
 0xfd2   : > { %3032 = vmatpush3.msra.mxu1 %v2768_v0 }
 0xfd3   : > { %v2238_v44 = vsel %vm262_vm0, %v2237_v43, 0.0  ;;  %3033 = vmatprep.subr.mxu1 %v3238_v8 }
 0xfd4   : > { %2239 = vadd.xlane.f32.xlu1 %v2238_v44  ;;  %3034 = vmatpush3.msra.mxu1 %v2766_v50 }
 0xfd5   : > { %3049 = vmatprep.subr.mxu1 %v3238_v8 }
 0xfe5   : > { %2359 = vrot.lane.b32.xlu1 %v2770_v19, %s3247_s9 }
 0xfe9   : > { %2357 = vrot.lane.b32.xlu1 %v2768_v0, %s3247_s9 }
0x105d   : > { %v2240_v45 = vpop.xlane.xlu1 %2239 }
0x105e   : > { %v2241_v46 = vmul.f32 0.03125, %v2240_v45 }
0x1060   : > { %v2242_v38 = vsub.f32 %v2237_v43, %v2241_v46  ;;  %v2461_v43 = vrot.slane %v3611_v25, %v1374_v57  ;;  %v2466_v46 = vrot.slane %v3611_v25, %v1379_v58 }
0x1061   : > { %v2360_v26 = vpop.permute.xlu1 %2359 }
0x1062   : > { %v2243_v47 = vmul.f32 %v2242_v38, %v2242_v38 }
0x1064   : > { %v2244_v48 = vsel %vm262_vm0, %v2243_v47, 0.0 }
0x1065   : > { %2245 = vadd.xlane.f32.xlu0 %v2244_v48  ;;  %v2358_v5 = vpop.permute.xlu1 %2357 }
0x107b   : > { %2361 = vrot.lane.b32.xlu0 %v2772_v49, %s3247_s9 }
0x107f   : > { %2355 = vrot.lane.b32.xlu0 %v2766_v50, %s3247_s9 }
0x10ee   : > { %v2246_v54 = vpop.xlane.xlu0 %2245 }
0x10ef   : > { %v2247_v55 = vmul.f32 0.03125, %v2246_v54 }
0x10f1   : > { %v2248_v56 = vadd.f32 1e-12, %v2247_v55 }
0x10f2   : > { %v2362_v2 = vpop.permute.xlu0 %2361 }
0x10f3   : > { %3167 = vrsqrt.f32 %v2248_v56  ;;  %3039 = vmatpush3.xpose.msk.msra.mxu0 %vm1276_vm5, %v2362_v2 }
0x10f4   : > { %3040 = vmatprep.subr.mxu0 %v3238_v8 }
0x10f6   : > { %v2356_v6 = vpop.permute.xlu0 %2355 }
0x10f7   : > { %3041 = vmatpush3.xpose.msk.msra.mxu0 %vm1276_vm5, %v2360_v26 }
0x10f8   : > { %3042 = vmatprep.subr.mxu0 %v3238_v8 }
0x10fb   : > { %3043 = vmatpush3.xpose.msk.msra.mxu0 %vm1276_vm5, %v2358_v5 }
0x10fc   : > { %3044 = vmatprep.subr.mxu0 %v3238_v8 }
0x10ff   : > { %3045 = vmatpush3.xpose.msk.msra.mxu0 %vm1276_vm5, %v2356_v6 }
0x1100   : > { %v3168_v60 = vpop.eup %3167 }
0x1101   : > { %v2250_v61 = vmul.f32 %v3168_v60, %v2242_v38 }
0x1103   : > { %v2255_v63 = vmul.f32 %v2254_v59, %v2250_v61  ;;  %v3175_v59 = vld [vmem:[%s3860_s5] sm:$0xf] }
0x1104   : > { %v2477_v60 = vrot.slane %v3175_v59, 2 }
0x1105   : > { %v2260_v1 = vadd.f32 %v2259_v62, %v2255_v63 }
0x1107   : > { %3036 = vmatmul.mubr.msk.f32.vlgmr.msra.gmra.mxu1 %vm262_vm0, %v2260_v1 }
0x1108   : > { %3057 = vmatprep.mubr.msk.f32.mxu1 %vm3239_vm1, %v3238_v8  ;;  %3050 = vmatpush3.msra.mxu1 %v2474_v35 }
0x1109   : > { %3051 = vmatprep.subr.mxu1 %v3238_v8 }
0x110a   : > { %3052 = vmatpush3.msra.mxu1 %v2472_v7 }
0x110b   : > { %3053 = vmatprep.subr.mxu1 %v3238_v8 }
0x110c   : > { %3054 = vmatpush3.msra.mxu1 %v2470_v36 }
0x110d   : > { %3055 = vmatprep.subr.mxu1 %v3238_v8 }
0x110e   : > { %3056 = vmatpush3.msra.mxu1 %v2468_v37 }
0x110f   : > { %3060 = vmatprep.subr.mxu1 %v3238_v8 }
0x11c7   : > { %v2334_v4 = vpop.f32.mrf.mxu1 }
0x11c8   : > { %v2335_v11 = vadd.f32 %v2334_v4, %v2264_v17 }
0x11c9   : > { %v3037_v12 = vpop.f32.mrf.mxu1 }
0x11ca   : > { %v2338_v52 = vmul.f32 %v2335_v11, %v2335_v11 }
0x11cc   : > { %v2339_v51 = vmul.f32 %v2338_v52, %v2335_v11 }
0x11ce   : > { %v2340_v3 = vmul.f32 0.044715, %v2339_v51 }
0x11d0   : > { %v2341_v13 = vadd.f32 %v2340_v3, %v2335_v11 }
0x11d2   : > { %v2342_v14 = vmul.f32 0.7978846, %v2341_v13 }
0x11d4   : > { %3169 = vtanh.f32 %v2342_v14 }
0x11e1   : > { %v3170_v15 = vpop.eup %3169 }
0x11e2   : > { %v2344_v18 = vadd.f32 1.0, %v3170_v15 }
0x11e4   : > { %v2345_v20 = vmul.f32 0.5, %v2344_v18 }
0x11e6   : > { %v2346_v21 = vmul.f32 %v2345_v20, %v2335_v11 }
0x11e8   : > { %3047 = vmatmul.mubr.msk.f32.vlgmr.msra.gmra.mxu0 %vm1276_vm5, %v2346_v21 }
0x12a8   : > { %v2440_v27 = vpop.f32.mrf.mxu0 }
0x12a9   : > { %v2441_v23 = vadd.f32 %v2440_v27, %v2350_v22 }
0x12aa   : > { %v3048_v24 = vpop.f32.mrf.mxu0 }
0x12ab   : > { %v2444_v28 = vadd.f32 %v2441_v23, %v2260_v1 }
0x12ad   : > { %v2445_v30 = vsel %vm262_vm0, %v2444_v28, 0.0 }
0x12ae   : > { %2446 = vadd.xlane.f32.xlu1 %v2445_v30 }
0x12bf   : > { %2575 = vrot.lane.b32.xlu1 %v2475_v39, %s3241_s13 }
0x12c3   : > { %2569 = vrot.lane.b32.xlu1 %v2472_v7, %s3241_s13 }
0x12c7   : > { %2565 = vrot.lane.b32.xlu1 %v2470_v36, %s3241_s13 }
0x12cb   : > { %2561 = vrot.lane.b32.xlu1 %v2468_v37, %s3241_s13 }
0x1337   : > { %v2447_v31 = vpop.xlane.xlu1 %2446 }
0x1338   : > { %v2448_v32 = vmul.f32 0.03125, %v2447_v31 }
0x133a   : > { %v2449_v29 = vsub.f32 %v2444_v28, %v2448_v32 }
0x133b   : > { %v2576_v49 = vpop.permute.xlu1 %2575 }
0x133c   : > { %v2450_v33 = vmul.f32 %v2449_v29, %v2449_v29 }
0x133e   : > { %v2451_v34 = vsel %vm262_vm0, %v2450_v33, 0.0 }
0x133f   : > { %2452 = vadd.xlane.f32.xlu0 %v2451_v34  ;;  %v2570_v0 = vpop.permute.xlu1 %2569 }
0x1343   : > { %v2566_v25 = vpop.permute.xlu1 %2565 }
0x1347   : > { %v2562_v55 = vpop.permute.xlu1 %2561 }
0x1355   : > { %2573 = vrot.lane.b32.xlu0 %v2474_v35, %s3241_s13 }
0x1359   : > { %2571 = vrot.lane.b32.xlu0 %v2473_v40, %s3241_s13 }
0x135d   : > { %2567 = vrot.lane.b32.xlu0 %v2471_v41, %s3241_s13 }
0x1361   : > { %2563 = vrot.lane.b32.xlu0 %v2469_v53, %s3241_s13 }
0x13c8   : > { %v2453_v42 = vpop.xlane.xlu0 %2452 }
0x13c9   : > { %v2454_v9 = vmul.f32 0.03125, %v2453_v42 }
0x13cb   : > { %v2455_v10 = vadd.f32 1e-12, %v2454_v9 }
0x13cc   : > { %v2574_v48 = vpop.permute.xlu0 %2573 }
0x13cd   : > { %3171 = vrsqrt.f32 %v2455_v10  ;;  %v2581_v19 = vsel %vm2577_vm6, %v2574_v48, %v2576_v49 }
0x13d0   : > { %v2572_v57 = vpop.permute.xlu0 %2571 }
0x13d1   : > { %v2580_v16 = vsel %vm2577_vm6, %v2570_v0, %v2572_v57 }
0x13d4   : > { %v2568_v58 = vpop.permute.xlu0 %2567 }
0x13d5   : > { %v2579_v50 = vsel %vm2577_vm6, %v2566_v25, %v2568_v58 }
0x13d8   : > { %v2564_v54 = vpop.permute.xlu0 %2563 }
0x13d9   : > { %v2578_v56 = vsel %vm2577_vm6, %v2562_v55, %v2564_v54 }
0x13da   : > { %v3172_v44 = vpop.eup %3171 }
0x13db   : > { %v2457_v45 = vmul.f32 %v3172_v44, %v2449_v29 }
0x13dd   : > { %v2462_v38 = vmul.f32 %v2461_v43, %v2457_v45 }
0x13df   : > { %v2467_v47 = vadd.f32 %v2466_v46, %v2462_v38 }
0x13e1   : > { %3058 = vmatmul.mubr.msk.f32.vlgmr.msra.gmra.mxu1 %vm262_vm0, %v2467_v47 }
0x13e2   : > { %3068 = vmatprep.mubr.msk.f32.mxu1 %vm3239_vm1, %v3238_v8  ;;  %3061 = vmatpush3.msra.mxu1 %v2581_v19 }
0x13e3   : > { %3062 = vmatprep.subr.mxu1 %v3238_v8 }
0x13e4   : > { %3063 = vmatpush3.msra.mxu1 %v2580_v16 }
0x13e5   : > { %3064 = vmatprep.subr.mxu1 %v3238_v8 }
0x13e6   : > { %3065 = vmatpush3.msra.mxu1 %v2579_v50 }
0x13e7   : > { %3066 = vmatprep.subr.mxu1 %v3238_v8  ;;  %v2586_v8 = vrot.slane %v3175_v59, 3 }
0x13e8   : > { %3067 = vmatpush3.msra.mxu1 %v2578_v56 }
0x14a1   : > { %v2548_v61 = vpop.f32.mrf.mxu1 }
0x14a2   : > { %v2549_v62 = vadd.f32 %v2548_v61, %v2477_v60 }
0x14a3   : > { %v3059_v63 = vpop.f32.mrf.mxu1 }
0x14a4   : > { %3173 = vtanh.f32 %v2549_v62 }
0x14b1   : > { %v3174_v1 = vpop.eup %3173 }
0x14b2   : > { %3069 = vmatmul.mubr.msk.f32.vlgmr.msra.gmra.mxu1 %vm262_vm0, %v3174_v1 }
0x1572   : > { %v2657_v2 = vpop.f32.mrf.mxu1 }
0x1573   : > { %v2658_v26 = vadd.f32 %v2657_v2, %v2586_v8 }
0x1574   : > { %v3070_v5 = vpop.f32.mrf.mxu1 }
0x1575   : > { %2661 = vst [vmem:[%s252_s18] sm:$0x1] %v2658_v26 }
0x1576   : > { %3189 = shalt.err (!%p3186_p3)
}
0x1577   : > { %s3190_s9 = scalar_lea.hbm %s3820_s29, 16  ;;  %s3194_s15 = scalar_lea.hbm %s3861_s6, 32 }
0x1578   : > { %p3191_p4 = scmp.ne.s32.totalorder %s3820_s29, %s3190_s9  ;;  %p3195_p9 = scmp.lt.s32.totalorder %s3820_s29, %s3861_s6 }
0x1579   : > { %p3196_p10 = scmp.lt.s32.totalorder %s3194_s15, %s3190_s9 }
0x157a   : > { %p3192_p7 = pnand %p3191_p4, %p3329_p5 }
0x157b   : > { %p3197_p11 = por %p3196_p10, %p3195_p9 }
0x157c   : > { %p3193_p8 = pneg %p3192_p7 }
0x157e   : > { %p3198_p12 = pnand %p3197_p11, %p3193_p8 }
0x1580   : > { %3201 = shalt.err (!%p3198_p12)
}
0x1581   : > { %3071 = dma.vmem_to_hbm [thread:$0]  (%p3329_p5), %s2676_s28, 16, %s3820_s29, %s2663_s10  }
0x1582 PF: > { %p3077_p13 = scmp.ge.s32.totalorder %s3236_s24, 2  ;;  %s2687_s18 = sand.u32 1, %s3224_s21  }
0x1583   : > { %s2688_s20 = scalar_lea.sflag [#allocation3], %s2687_s18 }
0x1584   : > { %p3074_p0 = pnand %p3077_p13, %p3333_p6 }
0x1586   : > { %p3075_p1 = pneg %p3074_p0 }
0x1588   : > { %3219 = dma.done.wait (%p3075_p1), %s2688_s20, 16  }
0x1589   : > { %3221 = vsyncadd (%p3075_p1), %s2688_s20, 4294967280  ;;  %p16_p2 = scmp.ge.s32.totalorder %s3316_s27, 4   ;;  %s3877_s21 = smov %s3228_s22 }
0x158a   : > { %s3878_s22 = smov %s3232_s23  ;;  %s3879_s23 = smov %s3327_s30 }
0x158b   : > { %s3880_s24 = smov %s3316_s27  ;;  %18 = sbr.rel (!%p16_p2) target bundleno = 3 (0x3), region = 84 }
0x1590   :  { %2692 = vsyncpa [#allocation3], 1 }
0x1591   :  { %2694 = vsyncpa [#allocation3 + $0x1], 1 }

</bundles_post_ra>
